<compile_context>
chip_gen: v5e
topology: v5e:2x2
jax: 0.10.0
libtpu: 0.0.40
codegen_flags: <defaults>
</compile_context>

<pallas_src>
import jax
import jax.numpy as jnp
from jax.experimental import pallas as pl
from jax.experimental.pallas import tpu as pltpu


def _round_up(x, m):
    return (x + m - 1) // m * m


def _choose_batch_tile(B, Sp, D1p, D2p, Pp, in_bytes, budget_bytes):
    """Largest power-of-two batch tile (>= 8) whose working set fits the VMEM budget."""
    cap = max(8, _round_up(B, 8))
    for tb in (128, 64, 32, 16, 8):
        if tb > cap:
            continue
        z = tb * Sp
        # double-buffered streamed blocks: input_1, input_2, mask bias (lane-padded tile), out
        stream = 2 * tb * (D1p + Sp * D2p) * in_bytes + 2 * tb * (Sp * 128 + D2p) * 4
        # f32 temporaries (b_x, upcast x2, h, logits/weight columns)
        temps = z * (2 * D2p + Pp + 2 * 128) * 4
        # constant weights (Pallas still allocates 2 buffers per input)
        weights = 2 * (D1p * D2p + D2p * Pp + Pp + Pp * 128) * in_bytes
        if stream + temps + weights <= budget_bytes:
            return tb
    return 8


def _bilinear_attention_kernel(x1_ref, x2_ref, bias_ref,
                               wbil_ref, wp_ref, bp_ref, wq_ref, bq_ref,
                               out_ref):
    # Per grid step (one tile of TB batch rows):
    #   x1_ref   : (TB, D1p)      x2_ref : (TB, Sp, D2p)   bias_ref : (TB, Sp, 1)
    #   wbil_ref : (D1p, D2p)     wp_ref : (D2p, Pp)       bp_ref   : (1, Pp)
    #   wq_ref   : (Pp, 1)        bq_ref : (1,) in SMEM    out_ref  : (TB, D2p)
    f32 = jnp.float32
    TB, Sp, D2p = x2_ref.shape
    Z = TB * Sp

    # (1) bilinear projection: one MXU matmul over the whole batch tile.
    x = jnp.dot(x1_ref[...], wbil_ref[...], preferred_element_type=f32)     # (TB, D2p)

    # (2) b_x = tanh((input_1 @ W)[:, None, :] * input_2)   (f32 elementwise)
    x2 = x2_ref[...].astype(f32)                                            # (TB, Sp, D2p)
    b_x = jnp.tanh(x[:, None, :] * x2)                                      # (TB, Sp, D2p)

    # (3) h = tanh(b_x @ Wp + bp): single (TB*Sp, D2p) @ (D2p, Pp) MXU matmul.
    b_x2d = b_x.reshape(Z, D2p)                                             # free: Sp % 8 == 0
    h = jnp.tanh(jnp.dot(b_x2d.astype(wp_ref.dtype), wp_ref[...],
                         preferred_element_type=f32) + bp_ref[...])         # (Z, Pp)

    # (4) logits = h @ wq + bq on the MXU, plus the precomputed mask/pad additive bias.
    logits = jnp.dot(h.astype(wq_ref.dtype), wq_ref[...],
                     preferred_element_type=f32) + bq_ref[0]                # (Z, 1)
    logits = logits.reshape(TB, Sp, 1) + bias_ref[...]                      # (TB, Sp, 1)

    # (5) numerically stable softmax over the sequence (sublane) axis, all in f32.
    m = jnp.max(logits, axis=1, keepdims=True)                              # (TB, 1, 1)
    p = jnp.exp(logits - m)
    w = p / jnp.sum(p, axis=1, keepdims=True)                               # (TB, Sp, 1)

    # (6) out = (sum_s input_2*w + sum_s b_x*w) / 2  ->  lane-dense (TB, D2p) store.
    out = 0.5 * jnp.sum((x2 + b_x) * w, axis=1)                             # (TB, D2p)
    out_ref[...] = out.astype(out_ref.dtype)


def bilinear_attention(input_1, input_2, params, mask=None, *,
                       batch_tile=None, mxu_dtype=jnp.float32,
                       vmem_block_budget_bytes=28 * 2**20):
    f32 = jnp.float32
    B, D1 = input_1.shape
    _, S, D2 = input_2.shape
    P = params["wp"].shape[1]

    # Pad feature dims to multiples of 128 (lanes) and S to a multiple of 8 (sublanes).
    D1p = _round_up(D1, 128)
    D2p = _round_up(D2, 128)
    Pp = _round_up(P, 128)
    Sp = _round_up(S, 8)

    in_bytes = jnp.dtype(mxu_dtype).itemsize
    if batch_tile is None:
        TB = _choose_batch_tile(B, Sp, D1p, D2p, Pp, in_bytes, vmem_block_budget_bytes)
    else:
        assert batch_tile % 8 == 0 and batch_tile >= 8, "batch_tile must be a multiple of 8"
        TB = batch_tile
    Bp = _round_up(B, TB)
    grid = (Bp // TB,)

    # ---- layout plumbing: zero-pad inputs / weights (stripped after the call) --------
    x1 = jnp.zeros((Bp, D1p), mxu_dtype).at[:B, :D1].set(input_1.astype(mxu_dtype))
    x2 = jnp.zeros((Bp, Sp, D2p), mxu_dtype).at[:B, :S, :D2].set(input_2.astype(mxu_dtype))

    # Additive softmax bias: 0 = keep, -1e9 = user-masked (matches masked_fill(-1e9)),
    # -2e9 = padded sequence position / padded batch row (never wins the max).
    if mask is None:
        user_bias = jnp.zeros((B, S), f32)
    else:
        user_bias = jnp.where(mask == 0, -1e9, 0.0).astype(f32)
    bias = jnp.full((Bp, Sp, 1), -2e9, f32).at[:B, :S, 0].set(user_bias)

    w_bil = jnp.zeros((D1p, D2p), mxu_dtype).at[:D1, :D2].set(
        params["w_bilinear"].astype(mxu_dtype))
    wp = jnp.zeros((D2p, Pp), mxu_dtype).at[:D2, :P].set(params["wp"].astype(mxu_dtype))
    bp = jnp.zeros((1, Pp), f32).at[0, :P].set(params["bp"].astype(f32))
    wq = jnp.zeros((Pp, 1), mxu_dtype).at[:P, 0].set(params["wq"].astype(mxu_dtype))
    bq = params["bq"].astype(f32).reshape(1)

    grid_spec = pltpu.PrefetchScalarGridSpec(
        num_scalar_prefetch=0,
        grid=grid,
        in_specs=[
            pl.BlockSpec((TB, D1p), lambda i: (i, 0)),            # input_1
            pl.BlockSpec((TB, Sp, D2p), lambda i: (i, 0, 0)),     # input_2
            pl.BlockSpec((TB, Sp, 1), lambda i: (i, 0, 0)),       # additive mask bias
            pl.BlockSpec((D1p, D2p), lambda i: (0, 0)),           # W_bilinear (constant)
            pl.BlockSpec((D2p, Pp), lambda i: (0, 0)),            # pre_pooling W (constant)
            pl.BlockSpec((1, Pp), lambda i: (0, 0)),              # pre_pooling bias
            pl.BlockSpec((Pp, 1), lambda i: (0, 0)),              # pooling W (column)
            pl.BlockSpec(memory_space=pltpu.MemorySpace.SMEM),    # pooling bias (scalar)
        ],
        out_specs=pl.BlockSpec((TB, D2p), lambda i: (i, 0)),      # lane-dense output
    )

    out = pl.pallas_call(
        _bilinear_attention_kernel,
        out_shape=jax.ShapeDtypeStruct((Bp, D2p), f32),
        grid_spec=grid_spec,
        compiler_params=pltpu.CompilerParams(
            dimension_semantics=("parallel",),        # batch tiles shard across TCs (v7x)
            vmem_limit_bytes=48 * 2**20,              # above 32MiB default, < v7x 64MiB
        ),
    )(x1, x2, bias, w_bil, wp, bp, wq, bq)

    return out[:B, :D2]


def reference(input_1, input_2, params, mask=None):
    # Pure-JAX reference mirroring the PyTorch module.
    x = input_1 @ params["w_bilinear"]                           # (B, D2)
    b_x = jnp.tanh(x[:, None, :] * input_2)                      # (B, S, D2)
    h = jnp.tanh(b_x @ params["wp"] + params["bp"])              # (B, S, P)
    logits = jnp.einsum("bsp,p->bs", h, params["wq"]) + params["bq"][0]
    if mask is not None:
        logits = jnp.where(mask == 0, -1e9, logits)
    w = jax.nn.softmax(logits, axis=-1)                          # (B, S)
    return (jnp.sum(input_2 * w[..., None], axis=1)
            + jnp.sum(b_x * w[..., None], axis=1)) / 2.0


def init_params(key, d1, d2, p):
    k1, k2, k3, k4, k5 = jax.random.split(key, 5)
    w_bil = jax.random.uniform(k1, (d1, d2), jnp.float32, -0.25, 0.25)
    kp = 1.0 / (d2 ** 0.5)
    wp = jax.random.uniform(k2, (d2, p), jnp.float32, -kp, kp)   # stored transposed
    bp = jax.random.uniform(k3, (p,), jnp.float32, -kp, kp)
    kq = 1.0 / (p ** 0.5)
    wq = jax.random.uniform(k4, (p,), jnp.float32, -kq, kq)
    bq = jax.random.uniform(k5, (1,), jnp.float32, -kq, kq)
    return {"w_bilinear": w_bil, "wp": wp, "bp": bp, "wq": wq, "bq": bq}


if __name__ == "__main__":
    B, S = 20, 10
    D1, D2, P = 32, 48, 16   # input1_dim, input2_dim, config.pre_pooling_dim

    key = jax.random.PRNGKey(0)
    kx1, kx2, kmask, kparam = jax.random.split(key, 4)

    input_1 = jax.random.normal(kx1, (B, D1), jnp.float32)
    input_2 = jax.random.normal(kx2, (B, S, D2), jnp.float32)
    mask = (jax.random.uniform(kmask, (B, S)) > 0.2).astype(jnp.float32)
    params = init_params(kparam, D1, D2, P)

    # no-mask path (auto batch tile)
    out = jax.block_until_ready(bilinear_attention(input_1, input_2, params, mask=None))
    ref = reference(input_1, input_2, params, mask=None)
    assert out.shape == (B, D2)
    assert jnp.allclose(out, ref, atol=1e-5, rtol=1e-5), "mismatch (no mask)"

    # masked path (auto batch tile)
    out_m = jax.block_until_ready(bilinear_attention(input_1, input_2, params, mask=mask))
    ref_m = reference(input_1, input_2, params, mask=mask)
    assert jnp.allclose(out_m, ref_m, atol=1e-5, rtol=1e-5), "mismatch (mask)"

    # masked path with an explicit smaller batch tile (exercises multi-step grid + padding)
    out_m8 = jax.block_until_ready(
        bilinear_attention(input_1, input_2, params, mask=mask, batch_tile=8))
    assert jnp.allclose(out_m8, ref_m, atol=1e-5, rtol=1e-5), "mismatch (mask, TB=8)"

    print("KERNEL_OK")
</pallas_src>

<mosaic_0001>
module attributes {stable_mosaic.version = 11 : i64} {
  func.func @_bilinear_attention_kernel(%arg0: i32, %arg1: memref<16x128xf32, #tpu.memory_space<vmem>>, %arg2: memref<16x16x128xf32, #tpu.memory_space<vmem>>, %arg3: memref<16x16x1xf32, #tpu.memory_space<vmem>>, %arg4: memref<128x128xf32, #tpu.memory_space<vmem>>, %arg5: memref<128x128xf32, #tpu.memory_space<vmem>>, %arg6: memref<1x128xf32, #tpu.memory_space<vmem>>, %arg7: memref<128x1xf32, #tpu.memory_space<vmem>>, %arg8: memref<1xf32, #tpu.memory_space<smem>>, %arg9: memref<16x128xf32, #tpu.memory_space<vmem>>) attributes {dimension_semantics = [#tpu.dimension_semantics<parallel>], iteration_bounds = array<i64: 2>, scalar_prefetch = 0 : i64, scratch_operands = 0 : i64, tpu.core_type = #tpu.core_type<tc>, window_params = [{transform_indices = @transform_0, window_bounds = array<i64: 16, 128>}, {transform_indices = @transform_1, window_bounds = array<i64: 16, 16, 128>}, {transform_indices = @transform_2, window_bounds = array<i64: 16, 16, 1>}, {pipeline_mode = #tpu.pipeline_mode<synchronous>, transform_indices = @transform_3, window_bounds = array<i64: 128, 128>}, {pipeline_mode = #tpu.pipeline_mode<synchronous>, transform_indices = @transform_4, window_bounds = array<i64: 128, 128>}, {pipeline_mode = #tpu.pipeline_mode<synchronous>, transform_indices = @transform_5, window_bounds = array<i64: 1, 128>}, {pipeline_mode = #tpu.pipeline_mode<synchronous>, transform_indices = @transform_6, window_bounds = array<i64: 128, 1>}, {transform_indices = @transform_7, window_bounds = array<i64: 1>}, {transform_indices = @transform_8, window_bounds = array<i64: 16, 128>}]} {
    %c0 = arith.constant 0 : index
    %c0_0 = arith.constant 0 : index
    %0 = vector.load %arg1[%c0, %c0_0] : memref<16x128xf32, #tpu.memory_space<vmem>>, vector<16x128xf32>
    %c0_1 = arith.constant 0 : index
    %c0_2 = arith.constant 0 : index
    %1 = vector.load %arg4[%c0_1, %c0_2] : memref<128x128xf32, #tpu.memory_space<vmem>>, vector<128x128xf32>
    %cst = arith.constant dense<0.000000e+00> : vector<16x128xf32>
    %2 = tpu.matmul %0, %1, %cst {dimension_numbers = #tpu.dot_dimension_numbers<[1], [0], [0], [1], [0, 0, 1, 1], [], []>} : vector<16x128xf32>, vector<128x128xf32>, vector<16x128xf32> -> vector<16x128xf32>
    %c0_3 = arith.constant 0 : index
    %c0_4 = arith.constant 0 : index
    %c0_5 = arith.constant 0 : index
    %3 = vector.load %arg2[%c0_3, %c0_4, %c0_5] : memref<16x16x128xf32, #tpu.memory_space<vmem>>, vector<16x16x128xf32>
    %4 = vector.shape_cast %2 : vector<16x128xf32> to vector<16x1x128xf32>
    %5 = vector.broadcast %4 : vector<16x1x128xf32> to vector<16x16x128xf32>
    %6 = arith.mulf %5, %3 : vector<16x16x128xf32>
    %7 = math.tanh %6 : vector<16x16x128xf32>
    %8 = vector.shape_cast %7 : vector<16x16x128xf32> to vector<256x128xf32>
    %c0_6 = arith.constant 0 : index
    %c0_7 = arith.constant 0 : index
    %9 = vector.load %arg5[%c0_6, %c0_7] : memref<128x128xf32, #tpu.memory_space<vmem>>, vector<128x128xf32>
    %cst_8 = arith.constant dense<0.000000e+00> : vector<256x128xf32>
    %10 = tpu.matmul %8, %9, %cst_8 {dimension_numbers = #tpu.dot_dimension_numbers<[1], [0], [0], [1], [0, 0, 1, 1], [], []>} : vector<256x128xf32>, vector<128x128xf32>, vector<256x128xf32> -> vector<256x128xf32>
    %c0_9 = arith.constant 0 : index
    %c0_10 = arith.constant 0 : index
    %11 = vector.load %arg6[%c0_9, %c0_10] : memref<1x128xf32, #tpu.memory_space<vmem>>, vector<1x128xf32>
    %12 = vector.broadcast %11 : vector<1x128xf32> to vector<256x128xf32>
    %13 = arith.addf %10, %12 : vector<256x128xf32>
    %14 = math.tanh %13 : vector<256x128xf32>
    %c0_11 = arith.constant 0 : index
    %c0_12 = arith.constant 0 : index
    %15 = vector.load %arg7[%c0_11, %c0_12] : memref<128x1xf32, #tpu.memory_space<vmem>>, vector<128x1xf32>
    %cst_13 = arith.constant dense<0.000000e+00> : vector<256x1xf32>
    %16 = tpu.matmul %14, %15, %cst_13 {dimension_numbers = #tpu.dot_dimension_numbers<[1], [0], [0], [1], [0, 0, 1, 1], [], []>} : vector<256x128xf32>, vector<128x1xf32>, vector<256x1xf32> -> vector<256x1xf32>
    %c0_14 = arith.constant 0 : index
    %17 = memref.load %arg8[%c0_14] : memref<1xf32, #tpu.memory_space<smem>>
    %18 = vector.broadcast %17 : f32 to vector<256x1xf32>
    %19 = arith.addf %16, %18 : vector<256x1xf32>
    %20 = vector.shape_cast %19 : vector<256x1xf32> to vector<16x16x1xf32>
    %c0_15 = arith.constant 0 : index
    %c0_16 = arith.constant 0 : index
    %c0_17 = arith.constant 0 : index
    %21 = vector.load %arg3[%c0_15, %c0_16, %c0_17] : memref<16x16x1xf32, #tpu.memory_space<vmem>>, vector<16x16x1xf32>
    %22 = arith.addf %20, %21 : vector<16x16x1xf32>
    %cst_18 = arith.constant dense<0xFF800000> : vector<16x1xf32>
    %23 = vector.multi_reduction <maximumf>, %22, %cst_18 [1] : vector<16x16x1xf32> to vector<16x1xf32>
    %24 = vector.shape_cast %23 : vector<16x1xf32> to vector<16x1x1xf32>
    %25 = vector.broadcast %24 : vector<16x1x1xf32> to vector<16x16x1xf32>
    %26 = arith.subf %22, %25 : vector<16x16x1xf32>
    %27 = math.exp %26 : vector<16x16x1xf32>
    %cst_19 = arith.constant dense<0.000000e+00> : vector<16x1xf32>
    %28 = vector.multi_reduction <add>, %27, %cst_19 [1] : vector<16x16x1xf32> to vector<16x1xf32>
    %29 = vector.shape_cast %28 : vector<16x1xf32> to vector<16x1x1xf32>
    %30 = vector.broadcast %29 : vector<16x1x1xf32> to vector<16x16x1xf32>
    %31 = arith.divf %27, %30 : vector<16x16x1xf32>
    %32 = arith.addf %3, %7 : vector<16x16x128xf32>
    %33 = vector.broadcast %31 : vector<16x16x1xf32> to vector<16x16x128xf32>
    %34 = arith.mulf %32, %33 : vector<16x16x128xf32>
    %cst_20 = arith.constant dense<0.000000e+00> : vector<16x128xf32>
    %35 = vector.multi_reduction <add>, %34, %cst_20 [1] : vector<16x16x128xf32> to vector<16x128xf32>
    %cst_21 = arith.constant 5.000000e-01 : f32
    %36 = vector.broadcast %cst_21 : f32 to vector<16x128xf32>
    %37 = arith.mulf %36, %35 : vector<16x128xf32>
    %c0_22 = arith.constant 0 : index
    %c0_23 = arith.constant 0 : index
    %38 = vector.load %arg9[%c0_22, %c0_23] : memref<16x128xf32, #tpu.memory_space<vmem>>, vector<16x128xf32>
    tpu.vector_store %arg9[%c0_22, %c0_23], %37 {strides = array<i32>} : memref<16x128xf32, #tpu.memory_space<vmem>>, vector<16x128xf32>,
    return
  }
  func.func @transform_0(%arg0: i32) -> (i32, i32) {
    %c0_i32 = arith.constant 0 : i32
    %c0_i32_0 = arith.constant 0 : i32
    return %arg0, %c0_i32 : i32, i32
  }
  func.func @transform_1(%arg0: i32) -> (i32, i32, i32) {
    %c0_i32 = arith.constant 0 : i32
    %c0_i32_0 = arith.constant 0 : i32
    %c0_i32_1 = arith.constant 0 : i32
    return %arg0, %c0_i32, %c0_i32_0 : i32, i32, i32
  }
  func.func @transform_2(%arg0: i32) -> (i32, i32, i32) {
    %c0_i32 = arith.constant 0 : i32
    %c0_i32_0 = arith.constant 0 : i32
    %c0_i32_1 = arith.constant 0 : i32
    return %arg0, %c0_i32, %c0_i32_0 : i32, i32, i32
  }
  func.func @transform_3(%arg0: i32) -> (i32, i32) {
    %c0_i32 = arith.constant 0 : i32
    %c0_i32_0 = arith.constant 0 : i32
    %c0_i32_1 = arith.constant 0 : i32
    return %c0_i32, %c0_i32_0 : i32, i32
  }
  func.func @transform_4(%arg0: i32) -> (i32, i32) {
    %c0_i32 = arith.constant 0 : i32
    %c0_i32_0 = arith.constant 0 : i32
    %c0_i32_1 = arith.constant 0 : i32
    return %c0_i32, %c0_i32_0 : i32, i32
  }
  func.func @transform_5(%arg0: i32) -> (i32, i32) {
    %c0_i32 = arith.constant 0 : i32
    %c0_i32_0 = arith.constant 0 : i32
    %c0_i32_1 = arith.constant 0 : i32
    return %c0_i32, %c0_i32_0 : i32, i32
  }
  func.func @transform_6(%arg0: i32) -> (i32, i32) {
    %c0_i32 = arith.constant 0 : i32
    %c0_i32_0 = arith.constant 0 : i32
    %c0_i32_1 = arith.constant 0 : i32
    return %c0_i32, %c0_i32_0 : i32, i32
  }
  func.func @transform_7(%arg0: i32) -> i32 {
    %c0_i32 = arith.constant 0 : i32
    %c0_i32_0 = arith.constant 0 : i32
    return %c0_i32 : i32
  }
  func.func @transform_8(%arg0: i32) -> (i32, i32) {
    %c0_i32 = arith.constant 0 : i32
    %c0_i32_0 = arith.constant 0 : i32
    return %arg0, %c0_i32 : i32, i32
  }
}

</mosaic_0001>

<bundles_post_ra>
// kernel: tpu_custom_call.1
= control target key start
LH: loop header
LB: loop body
LE: loop exit
PB: predicated region body
PF: predicated region fallthrough
CT: control target
= control target key end

     0   :  { %s3703_s0 = inlined_call_operand.hbm [shape: f32[32,128], index: 0, kind: input, shape index: {}]   ;;  %s3704_s1 = inlined_call_operand.vmem [shape: f32[32,16,128], index: 1, kind: input, shape index: {}]   ;;  %s3705_s2 = inlined_call_operand.vmem [shape: f32[32,16,1], index: 2, kind: input, shape index: {}]   ;;  %s3706_s3 = inlined_call_operand.vmem [shape: f32[128,128], index: 3, kind: input, shape index: {}]   ;;  %s3707_s4 = inlined_call_operand.hbm [shape: f32[128,128], index: 4, kind: input, shape index: {}]   ;;  %s3708_s5 = inlined_call_operand.vmem [shape: f32[1,128], index: 5, kind: input, shape index: {}]   ;;  %s3709_s6 = inlined_call_operand.vmem [shape: f32[128,1], index: 6, kind: input, shape index: {}]   ;;  %s3710_s7 = inlined_call_operand.<no memory space> [shape: f32[1], index: 7, kind: input, shape index: {}]   ;;  %s3711_s8 = inlined_call_operand.hbm [shape: f32[32,128], index: 8, kind: output, shape index: {}]  }
   0x1   :  { %3714 = sst [smem:[#allocation18_spill]] %s3707_s4 }
   0x2   :  { %13 = sst [smem:[#allocation2]] %s3710_s7 }
   0x3   :  { %14 = vsyncpa [#allocation4], 0 }
   0x4   :  { %16 = vsyncpa [#allocation4 + $0x1], 0 }
   0x5   :  { %17 = vsyncpa [#allocation7], 0 }
   0x6   :  { %18 = vsyncpa [#allocation5], 0 }
   0x7   :  { %20 = vsyncpa [#allocation5 + $0x1], 0  ;;  %s2663_s29 = smov 0   ;;  %s2665_s30 = smov 0  }
   0x8   :  { %s2667_s9 = smov 0   ;;  %s2669_s10 = smov 0  }
   0x9 LB: > { %s2684_s7 = sadd.s32 4294967295, %s2607_s10   ;;  %s2098_s11 = sadd.s32 4294967294, %s2607_s10   ;;  %s2607_s10 = sphi %s2669_s10, %s3747_s10   ;;  %s2603_s9 = sphi %s2667_s9, %s3746_s9   ;;  %s2599_s30 = sphi %s2665_s30, %s3745_s30   ;;  %s2595_s29 = sphi %s2663_s29, %s3744_s29  }
   0xa   : > { %p46_p0 = scmp.ne.s32.totalorder %s2599_s30, %s2595_s29  ;;  %p47_p1 = scmp.eq.s32.totalorder %s2684_s7, 0 }
   0xb   : > { %p227_p2 = scmp.eq.s32.totalorder %s2684_s7, 1  ;;  %p233_p3 = scmp.eq.s32.totalorder %s2098_s11, 1 }
   0xc   : > { %p2693_p4 = por %p47_p1, %p46_p0  ;;  %p2099_p5 = scmp.ge.s32.totalorder %s2607_s10, 1 }
   0xd   : > { %p2698_p6 = por %p233_p3, %p46_p0  ;;  %p240_p7 = scmp.lt.s32.totalorder %s2607_s10, 3 }
   0xe   : > { %s3717_s4 = sld [smem:[#allocation18_spill]]  ;;  %s2609_s18 = smov [#allocation6]  }
   0xf   : > { %p2706_p8 = pnand %p2099_p5, %p240_p7  ;;  %s256_s19 = sshll.u32 %s2609_s18, 4  ;;  %s257_s19 = int_to_ptr.vmem [resolvable:$true] %s256_s19 }
  0x10   : > { %s2716_s20 = sadd.s32 1, %s2607_s10   ;;  %s3712_s21 = smov 128  }
  0x11   : > { %p2180_p9 = pneg %p2706_p8  ;;  %s3713_s22 = smov 8  }
  0x12   : > { %s30_s23 = ssub.s32 %s2607_s10, %s2716_s20  ;;  %s33_s24 = sadd.s32 1, %s2603_s9 }
  0x13   : > { %p2181_p10 = pnand %p2180_p9, %p47_p1  ;;  %p31_p12 = scmp.eq.s32.totalorder %s30_s23, 0 }
  0x14   : > { %s254_s16 = sshll.u32 %s3717_s4, 4  ;;  %p40_p13 = scmp.ne.s32.totalorder %s2603_s9, %s2599_s30  ;;  %s255_s16 = int_to_ptr.hbm [resolvable:$true] %s254_s16 }
  0x15   : > { %2183 = dma.hbm_to_vmem [thread:$0]  (!%p2181_p10), %s255_s16, 2048, %s257_s19, [#allocation7], %s3712_s21, %s3712_s21, %s3713_s22  }
  0x16   : > { %p41_p0 = scmp.eq.s32.totalorder %s2607_s10, 0  ;;  %p2732_p3 = por %p227_p2, %p40_p13 }
  0x17   : > { %s2728_s25 = scalar_select %p31_p12, %s2603_s9, %s33_s24  }
  0x18   : > { %p2193_p5 = scmp.lt.s32.totalorder %s2607_s10, 2  ;;  %s279_s27 = sand.u32 1, %s2603_s9  }
  0x19   : > { %s2120_s28 = sshll.u32 %s2607_s10, 4  ;;  %p42_p7 = por %p41_p0, %p40_p13 }
  0x1a   : > { %s2102_s11 = sshll.u32 %s279_s27, 4  ;;  %s288_s16 = scalar_lea.hbm %s3703_s0, %s2120_s28 }
  0x1b   : > { %s289_s18 = sshll.u32 %s288_s16, 4  ;;  %s283_s19 = scalar_lea.vmem [#allocation3], %s2102_s11  ;;  %s290_s18 = int_to_ptr.hbm [resolvable:$true] %s289_s18 }
  0x1c   : > { %s291_s23 = sshll.u32 %s283_s19, 4  ;;  %p2742_p9 = pnand %p2193_p5, %p42_p7  ;;  %s292_s23 = int_to_ptr.vmem [resolvable:$true] %s291_s23 }
  0x1d   : > { %s280_s21 = scalar_lea.sflag [#allocation4], %s279_s27  ;;  %s2507_s22 = sshra.s32 %s290_s18, 4  ;;  %s2508_s22 = int_to_ptr.hbm [resolvable:$true] %s2507_s22 }
  0x1e   : > { %s2509_s4 = scalar_lea.hbm %s2508_s22, 16  ;;  %p2511_p10 = pneg %p2742_p9 }
  0x1f   : > { %p2510_p2 = scmp.ne.s32.totalorder %s2508_s22, %s2509_s4  ;;  %s2514_s11 = scalar_lea.hbm %s3703_s0, 32 }
  0x20   : > { %p2515_p0 = scmp.lt.s32.totalorder %s2508_s22, %s3703_s0  ;;  %p2516_p5 = scmp.lt.s32.totalorder %s2514_s11, %s2509_s4 }
  0x21   : > { %p2512_p12 = pnand %p2511_p10, %p2510_p2 }
  0x22   : > { %p2517_p7 = por %p2516_p5, %p2515_p0 }
  0x23   : > { %p2513_p13 = pneg %p2512_p12 }
  0x25   : > { %p2518_p11 = pnand %p2517_p7, %p2513_p13 }
  0x27   : > { %2521 = shalt.err (!%p2518_p11)
}
  0x28   : > { %s3721_s27 = smov 8   ;;  %s3722_s19 = smov 128  }
  0x29   : > { %2187 = dma.hbm_to_vmem [thread:$0]  (!%p2742_p9), %s290_s18, 256, %s292_s23, %s280_s21, %s3722_s19, %s3722_s19, %s3721_s27  }
  0x2a   : > { %323 = sbr.rel (%p2706_p8) target bundleno = 932 (0x3a4), region = 52 }
  0x2f   : > { %s2762_s28 = sand.u32 1, %s2599_s30  }
  0x30   : > { %s2106_s4 = sshll.u32 %s2762_s28, 4  ;;  %s326_s22 = scalar_lea.sflag [#allocation4], %s2762_s28 }
  0x31   : > { %s2768_s14 = scalar_lea.vmem [#allocation3], %s2106_s4 }
  0x32   : > { %2582 = dma.done.wait (%p2693_p4), %s326_s22, 256  }
  0x33   : > { %2584 = vsyncadd (%p2693_p4), %s326_s22, 4294967040 }
  0x34   : > { %2586 = dma.done.wait (%p47_p1), [#allocation7], 2048  }
  0x35   : > { %2588 = vsyncadd (%p47_p1), [#allocation7], 4294965248  ;;  %v413_v0 = vld [vmem:[%s3706_s3 + $0x78] sm:$0xff]  ;;  %v412_v1 = vld [vmem:[%s3706_s3 + $0x70] sm:$0xff]  ;;  %s762_s24 = sld [smem:[#allocation2]]  ;;  %vm941_vm0 = vcmask 7168  }
  0x36   : > { %414 = vmatpush.msra.mxu0 %v413_v0  ;;  %v411_v2 = vld [vmem:[%s3706_s3 + $0x68] sm:$0xff]  ;;  %v410_v3 = vld [vmem:[%s3706_s3 + $0x60] sm:$0xff]  ;;  %v409_v4 = vld [vmem:[%s3706_s3 + $0x58] sm:$0xff] }
  0x37   : > { %v408_v5 = vld [vmem:[%s3706_s3 + $0x50] sm:$0xff]  ;;  %v596_v6 = vld [vmem:[#allocation6 + $0x78] sm:$0xff]  ;;  %v407_v8 = vld [vmem:[%s3706_s3 + $0x48] sm:$0xff] }
  0x38   : > { %415 = vmatpush.msra.mxu0 %v412_v1  ;;  %v595_v7 = vld [vmem:[#allocation6 + $0x70] sm:$0xff]  ;;  %601 = vmatpush.msra.mxu1 %v596_v6  ;;  %v594_v9 = vld [vmem:[#allocation6 + $0x68] sm:$0xff]  ;;  %v406_v10 = vld [vmem:[%s3706_s3 + $0x40] sm:$0xff] }
  0x39   : > { %2124 = vmatpush.msra.mxu3 %v596_v6  ;;  %v593_v11 = vld [vmem:[#allocation6 + $0x60] sm:$0xff]  ;;  %v405_v12 = vld [vmem:[%s3706_s3 + $0x38] sm:$0xff]  ;;  %v404_v14 = vld [vmem:[%s3706_s3 + $0x30] sm:$0xff] }
  0x3a   : > { %416 = vmatpush.msra.mxu0 %v411_v2  ;;  %602 = vmatpush.msra.mxu1 %v595_v7  ;;  %v592_v13 = vld [vmem:[#allocation6 + $0x58] sm:$0xff]  ;;  %v591_v15 = vld [vmem:[#allocation6 + $0x50] sm:$0xff]  ;;  %v403_v16 = vld [vmem:[%s3706_s3 + $0x28] sm:$0xff] }
  0x3b   : > { %2125 = vmatpush.msra.mxu3 %v595_v7  ;;  %v590_v17 = vld [vmem:[#allocation6 + $0x48] sm:$0xff]  ;;  %v402_v18 = vld [vmem:[%s3706_s3 + $0x20] sm:$0xff]  ;;  %v401_v20 = vld [vmem:[%s3706_s3 + $0x18] sm:$0xff] }
  0x3c   : > { %417 = vmatpush.msra.mxu0 %v410_v3  ;;  %603 = vmatpush.msra.mxu1 %v594_v9  ;;  %v589_v19 = vld [vmem:[#allocation6 + $0x40] sm:$0xff]  ;;  %v588_v21 = vld [vmem:[#allocation6 + $0x38] sm:$0xff]  ;;  %v400_v22 = vld [vmem:[%s3706_s3 + $0x10] sm:$0xff] }
  0x3d   : > { %2126 = vmatpush.msra.mxu3 %v594_v9  ;;  %v587_v23 = vld [vmem:[#allocation6 + $0x30] sm:$0xff]  ;;  %v399_v24 = vld [vmem:[%s3706_s3 + $0x8] sm:$0xff]  ;;  %v398_v25 = vld [vmem:[%s3706_s3] sm:$0xff] }
  0x3e   : > { %418 = vmatpush.msra.mxu0 %v409_v4  ;;  %604 = vmatpush.msra.mxu1 %v593_v11  ;;  %v396_v26 = vld [vmem:[%s2768_s14] sm:$0xff]  ;;  %v397_v27 = vld [vmem:[%s2768_s14 + $0x8] sm:$0xff]  ;;  %s2829_s14 = sshll.u32 %s2684_s7, 4  ;;  %s1976_s7 = scalar_lea.sflag [#allocation5], %s2762_s28 }
  0x3f   : > { %2127 = vmatpush.msra.mxu3 %v593_v11  ;;  %v586_v28 = vld [vmem:[#allocation6 + $0x28] sm:$0xff]  ;;  %v585_v29 = vld [vmem:[#allocation6 + $0x20] sm:$0xff]  ;;  %v584_v30 = vld [vmem:[#allocation6 + $0x18] sm:$0xff]  ;;  %p382_p1 = scmp.lt.s32.totalorder %s2829_s14, 31 }
  0x40   : > { %419 = vmatpush.msra.mxu0 %v408_v5  ;;  %605 = vmatpush.msra.mxu1 %v592_v13  ;;  %v583_v31 = vld [vmem:[#allocation6 + $0x10] sm:$0xff]  ;;  %v582_v32 = vld [vmem:[#allocation6 + $0x8] sm:$0xff]  ;;  %v581_v33 = vld [vmem:[#allocation6] sm:$0xff] }
  0x41   : > { %2128 = vmatpush.msra.mxu3 %v592_v13  ;;  %s2833_s16 = scalar_select %p382_p1, %s2829_s14, 31 }
  0x42   : > { %420 = vmatpush.msra.mxu0 %v407_v8  ;;  %606 = vmatpush.msra.mxu1 %v591_v15 }
  0x43   : > { %2129 = vmatpush.msra.mxu3 %v591_v15  ;;  %s2121_s27 = sshll.u32 %s2833_s16, 4  ;;  %s3633_s16 = scalar_lea.vmem [#allocation8], %s2106_s4 }
  0x44   : > { %421 = vmatpush.msra.mxu0 %v406_v10  ;;  %607 = vmatpush.msra.mxu1 %v590_v17  ;;  %s2841_s17 = scalar_lea.vmem %s3704_s1, %s2121_s27  ;;  %s3113_s15 = scalar_lea.vmem %s3705_s2, %s2121_s27 }
  0x45   : > { %2130 = vmatpush.msra.mxu3 %v590_v17  ;;  %v437_v35 = vld [vmem:[%s2841_s17] sm:$0xff]  ;;  %v438_v36 = vld [vmem:[%s2841_s17 + $0x8] sm:$0xff]  ;;  %v439_v41 = vld [vmem:[%s2841_s17 + $0x10] sm:$0xff]  ;;  %s1988_s19 = sshll.u32 %s3633_s16, 4  ;;  %s1989_s19 = int_to_ptr.vmem [resolvable:$true] %s1988_s19 }
  0x46   : > { %422 = vmatpush.msra.mxu0 %v405_v12  ;;  %608 = vmatpush.msra.mxu1 %v589_v19  ;;  %v440_v42 = vld [vmem:[%s2841_s17 + $0x18] sm:$0xff]  ;;  %v441_v43 = vld [vmem:[%s2841_s17 + $0x20] sm:$0xff]  ;;  %v442_v49 = vld [vmem:[%s2841_s17 + $0x28] sm:$0xff] }
  0x47   : > { %2131 = vmatpush.msra.mxu3 %v589_v19  ;;  %v443_v50 = vld [vmem:[%s2841_s17 + $0x30] sm:$0xff]  ;;  %v444_v55 = vld [vmem:[%s2841_s17 + $0x38] sm:$0xff]  ;;  %v445_v59 = vld [vmem:[%s2841_s17 + $0x40] sm:$0xff] }
  0x48   : > { %423 = vmatpush.msra.mxu0 %v404_v14  ;;  %609 = vmatpush.msra.mxu1 %v588_v21  ;;  %v454_v61 = vld [vmem:[%s2841_s17 + $0x88] sm:$0xff]  ;;  %v455_v4 = vld [vmem:[%s2841_s17 + $0x90] sm:$0xff] }
  0x49   : > { %2132 = vmatpush.msra.mxu3 %v588_v21  ;;  %v446_v7 = vld [vmem:[%s2841_s17 + $0x48] sm:$0xff] }
  0x4a   : > { %424 = vmatpush.msra.mxu0 %v403_v16  ;;  %610 = vmatpush.msra.mxu1 %v587_v23 }
  0x4b   : > { %2133 = vmatpush.msra.mxu3 %v587_v23 }
  0x4c   : > { %425 = vmatpush.msra.mxu0 %v402_v18  ;;  %611 = vmatpush.msra.mxu1 %v586_v28 }
  0x4d   : > { %2134 = vmatpush.msra.mxu3 %v586_v28 }
  0x4e   : > { %426 = vmatpush.msra.mxu0 %v401_v20  ;;  %612 = vmatpush.msra.mxu1 %v585_v29 }
  0x4f   : > { %2135 = vmatpush.msra.mxu3 %v585_v29 }
  0x50   : > { %427 = vmatpush.msra.mxu0 %v400_v22  ;;  %613 = vmatpush.msra.mxu1 %v584_v30 }
  0x51   : > { %2136 = vmatpush.msra.mxu3 %v584_v30 }
  0x52   : > { %428 = vmatpush.msra.mxu0 %v399_v24  ;;  %614 = vmatpush.msra.mxu1 %v583_v31 }
  0x53   : > { %2137 = vmatpush.msra.mxu3 %v583_v31 }
  0x54   : > { %429 = vmatpush.msra.mxu0 %v398_v25  ;;  %615 = vmatpush.msra.mxu1 %v582_v32 }
  0x55   : > { %430 = vmatmul.f32.vlgmr.msra.gmra.mxu0 %v396_v26  ;;  %2138 = vmatpush.msra.mxu3 %v582_v32  ;;  %v456_v26 = vld [vmem:[%s2841_s17 + $0x98] sm:$0xff] }
  0x56   : > { %616 = vmatpush.msra.mxu1 %v581_v33 }
  0x57   : > { %2139 = vmatpush.msra.mxu3 %v581_v33 }
  0x5d   : > { %433 = vmatmul.f32.gmra.mxu0 %v397_v27 }
  0xd2   : > { %v2843_v34 = vpop.f32.mrf.mxu0 }
  0xd3   : > { %v485_v37 = vperm.slane %v2843_v34, 0  ;;  %v471_v38 = vrot.slane %v2843_v34, 1  ;;  %v472_v39 = vrot.slane %v2843_v34, 2  ;;  %v473_v40 = vrot.slane %v2843_v34, 3 }
  0xd4   : > { %v474_v44 = vrot.slane %v2843_v34, 4 }
  0xd5   : > { %v517_v45 = vmul.f32 %v485_v37, %v437_v35  ;;  %v518_v46 = vmul.f32 %v485_v37, %v438_v36  ;;  %v486_v47 = vperm.slane %v471_v38, 0  ;;  %v487_v48 = vperm.slane %v472_v39, 0  ;;  %v458_v38 = vld [vmem:[%s2841_s17 + $0xa8] sm:$0xff] }
  0xd6   : > { %v488_v51 = vperm.slane %v473_v40, 0  ;;  %v489_v57 = vperm.slane %v474_v44, 0 }
  0xd7   : > { %2238 = vtanh.f32 %v517_v45  ;;  %v519_v52 = vmul.f32 %v486_v47, %v439_v41  ;;  %v520_v53 = vmul.f32 %v486_v47, %v440_v42  ;;  %v521_v54 = vmul.f32 %v487_v48, %v441_v43 }
  0xd8   : > { %2240 = vtanh.f32 %v518_v46  ;;  %v522_v56 = vmul.f32 %v487_v48, %v442_v49  ;;  %v523_v58 = vmul.f32 %v488_v51, %v443_v50  ;;  %v524_v62 = vmul.f32 %v488_v51, %v444_v55  ;;  %v460_v46 = vld [vmem:[%s2841_s17 + $0xb8] sm:$0xff]  ;;  %v461_v51 = vld [vmem:[%s2841_s17 + $0xc0] sm:$0xff] }
  0xd9   : > { %2242 = vtanh.f32 %v519_v52  ;;  %v525_v1 = vmul.f32 %v489_v57, %v445_v59  ;;  %v526_v15 = vmul.f32 %v489_v57, %v446_v7 }
  0xda   : > { %v2859_v60 = vpop.f32.mrf.mxu0  ;;  %2244 = vtanh.f32 %v520_v53 }
  0xdb   : > { %v493_v63 = vperm.slane %v2859_v60, 0  ;;  %v478_v0 = vrot.slane %v2859_v60, 1  ;;  %2246 = vtanh.f32 %v521_v54  ;;  %v479_v29 = vrot.slane %v2859_v60, 2  ;;  %v462_v54 = vld [vmem:[%s2841_s17 + $0xc8] sm:$0xff] }
  0xdc   : > { %2248 = vtanh.f32 %v522_v56  ;;  %v480_v40 = vrot.slane %v2859_v60, 3  ;;  %v481_v48 = vrot.slane %v2859_v60, 4  ;;  %v482_v56 = vrot.slane %v2859_v60, 5 }
  0xdd   : > { %v2239_v2 = vpop.eup %2238  ;;  %v534_v3 = vmul.f32 %v493_v63, %v454_v61  ;;  %v494_v5 = vperm.slane %v478_v0, 0  ;;  %2250 = vtanh.f32 %v523_v58  ;;  %v495_v33 = vperm.slane %v479_v29, 0  ;;  %v2925_v61 = vld [vmem:[%s2841_s17 + $0xd0] sm:$0xff] }
  0xde   : > { %v2241_v6 = vpop.eup %2240  ;;  %617 = vmatmul.f32.vlgmr.msra.gmra.mxu1 %v2239_v2  ;;  %2252 = vtanh.f32 %v524_v62  ;;  %v2868_v8 = vadd.f32 %v2239_v2, %v437_v35  ;;  %v457_v35 = vld [vmem:[%s2841_s17 + $0xa0] sm:$0xff]  ;;  %v475_v58 = vrot.slane %v2843_v34, 5  ;;  %v447_v0 = vld [vmem:[%s2841_s17 + $0x50] sm:$0xff] }
  0xdf   : > { %v2243_v9 = vpop.eup %2242  ;;  %2254 = vtanh.f32 %v534_v3  ;;  %v535_v11 = vmul.f32 %v494_v5, %v455_v4  ;;  %v2870_v12 = vadd.f32 %v2241_v6, %v438_v36  ;;  %v536_v28 = vmul.f32 %v494_v5, %v456_v26  ;;  %v2933_v4 = vld [vmem:[%s2841_s17 + $0xd8] sm:$0xff]  ;;  %v2958_v26 = vld [vmem:[%s2841_s17 + $0xe0] sm:$0xff]  ;;  %v756_v29 = vld [vmem:[%s3709_s6 + $0x50] sm:$0xff] }
  0xe0   : > { %v2245_v10 = vpop.eup %2244  ;;  %2256 = vtanh.f32 %v525_v1  ;;  %v2872_v13 = vadd.f32 %v2243_v9, %v439_v41  ;;  %v537_v36 = vmul.f32 %v495_v33, %v457_v35  ;;  %v538_v39 = vmul.f32 %v495_v33, %v458_v38  ;;  %v761_v5 = vld [vmem:[%s3709_s6 + $0x78] sm:$0xff]  ;;  %v449_v33 = vld [vmem:[%s2841_s17 + $0x60] sm:$0xff]  ;;  %v755_v35 = vld [vmem:[%s3709_s6 + $0x48] sm:$0xff] }
  0xe1   : > { %v2247_v14 = vpop.eup %2246  ;;  %v2874_v16 = vadd.f32 %v2245_v10, %v440_v42  ;;  %2258 = vtanh.f32 %v535_v11  ;;  %v496_v42 = vperm.slane %v480_v40, 0  ;;  %v490_v62 = vperm.slane %v475_v58, 0  ;;  %764 = vmatpush.msrb.mxu0 %v761_v5  ;;  %2140 = vmatpush.msra.mxu2 %v761_v5  ;;  %v754_v38 = vld [vmem:[%s3709_s6 + $0x40] sm:$0xff]  ;;  %v467_v58 = vld [vmem:[%s2841_s17 + $0xf0] sm:$0xff] }
  0xe2   : > { %v2249_v17 = vpop.eup %2248  ;;  %v2876_v18 = vadd.f32 %v2247_v14, %v441_v43  ;;  %2260 = vtanh.f32 %v526_v15  ;;  %v459_v43 = vld [vmem:[%s2841_s17 + $0xb0] sm:$0xff]  ;;  %2141 = vmatpush.msrb.mxu3 %v761_v5  ;;  %v483_v11 = vrot.slane %v2859_v60, 6 }
  0xe3   : > { %v2251_v19 = vpop.eup %2250  ;;  %v2878_v20 = vadd.f32 %v2249_v17, %v442_v49  ;;  %2262 = vtanh.f32 %v536_v28  ;;  %v539_v44 = vmul.f32 %v496_v42, %v459_v43  ;;  %v540_v47 = vmul.f32 %v496_v42, %v460_v46  ;;  %v757_v28 = vld [vmem:[%s3709_s6 + $0x58] sm:$0xff]  ;;  %v2981_v43 = vld [vmem:[%s2841_s17 + $0xe8] sm:$0xff]  ;;  %v752_v46 = vld [vmem:[%s3709_s6 + $0x30] sm:$0xff] }
  0xe4   : > { %v2253_v21 = vpop.eup %2252  ;;  %v2880_v22 = vadd.f32 %v2251_v19, %v443_v50  ;;  %2264 = vtanh.f32 %v537_v36  ;;  %v497_v50 = vperm.slane %v481_v48, 0  ;;  %v527_v3 = vmul.f32 %v490_v62, %v447_v0  ;;  %v751_v48 = vld [vmem:[%s3709_s6 + $0x28] sm:$0xff]  ;;  %v453_v0 = vld [vmem:[%s2841_s17 + $0x80] sm:$0xff]  ;;  %v451_v5 = vld [vmem:[%s2841_s17 + $0x70] sm:$0xff] }
  0xe5   : > { %v2882_v23 = vpop.eup %2254  ;;  %v2884_v24 = vadd.f32 %v2253_v21, %v444_v55  ;;  %2266 = vtanh.f32 %v538_v39 }
  0xe6   : > { %v2257_v25 = vpop.eup %2256  ;;  %620 = vmatmul.f32.gmra.mxu1 %v2241_v6  ;;  %668 = vmatmul.f32.vlgmr.msra.gmra.mxu3 %v2882_v23  ;;  %2268 = vtanh.f32 %v539_v44  ;;  %v541_v52 = vmul.f32 %v497_v50, %v461_v51  ;;  %v542_v55 = vmul.f32 %v497_v50, %v462_v54  ;;  %v760_v6 = vld [vmem:[%s3709_s6 + $0x70] sm:$0xff]  ;;  %v753_v44 = vld [vmem:[%s3709_s6 + $0x38] sm:$0xff]  ;;  %v484_v51 = vrot.slane %v2859_v60, 7 }
  0xe7   : > { %v2888_v27 = vadd.f32 %v2257_v25, %v445_v59  ;;  %v2891_v30 = vpop.eup %2258  ;;  %2270 = vtanh.f32 %v540_v47  ;;  %v498_v59 = vperm.slane %v482_v56, 0  ;;  %765 = vmatpush.msrb.mxu0 %v760_v6  ;;  %2142 = vmatpush.msra.mxu2 %v760_v6  ;;  %v450_v47 = vld [vmem:[%s2841_s17 + $0x68] sm:$0xff] }
  0xe8   : > { %v2261_v31 = vpop.eup %2260  ;;  %2272 = vtanh.f32 %v541_v52  ;;  %2143 = vmatpush.msrb.mxu3 %v760_v6  ;;  %v748_v6 = vld [vmem:[%s3709_s6 + $0x10] sm:$0xff] }
  0xe9   : > { %v2893_v32 = vadd.f32 %v2261_v31, %v446_v7  ;;  %v2897_v37 = vpop.eup %2262  ;;  %2274 = vtanh.f32 %v542_v55  ;;  %v543_v1 = vmul.f32 %v498_v59, %v2925_v61  ;;  %v448_v7 = vld [vmem:[%s2841_s17 + $0x58] sm:$0xff]  ;;  %v477_v55 = vrot.slane %v2843_v34, 7 }
  0xea   : > { %v2902_v41 = vpop.eup %2264 }
  0xeb   : > { %v2906_v45 = vpop.eup %2266  ;;  %2276 = vtanh.f32 %v543_v1  ;;  %v492_v1 = vperm.slane %v477_v55, 0 }
  0xec   : > { %v2911_v49 = vpop.eup %2268  ;;  %2278 = vtanh.f32 %v527_v3  ;;  %v533_v3 = vmul.f32 %v493_v63, %v453_v0 }
  0xed   : > { %v2915_v53 = vpop.eup %2270  ;;  %v531_v60 = vmul.f32 %v492_v1, %v451_v5 }
  0xee   : > { %623 = vmatmul.f32.gmra.mxu1 %v2243_v9  ;;  %671 = vmatmul.f32.gmra.mxu3 %v2891_v30  ;;  %v2920_v57 = vpop.eup %2272  ;;  %v759_v9 = vld [vmem:[%s3709_s6 + $0x68] sm:$0xff] }
  0xef   : > { %v2929_v2 = vpop.eup %2274  ;;  %766 = vmatpush.msrb.mxu0 %v759_v9  ;;  %2144 = vmatpush.msra.mxu2 %v759_v9 }
  0xf0   : > { %2145 = vmatpush.msrb.mxu3 %v759_v9  ;;  %v468_v9 = vld [vmem:[%s2841_s17 + $0xf8] sm:$0xff] }
  0xf1   : > { %v2950_v15 = vpop.eup %2276 }
  0xf6   : > { %626 = vmatmul.f32.gmra.mxu1 %v2245_v10  ;;  %674 = vmatmul.f32.gmra.mxu3 %v2897_v37  ;;  %v544_v10 = vmul.f32 %v498_v59, %v2933_v4  ;;  %v500_v59 = vperm.slane %v484_v51, 0 }
  0xf8   : > { %2280 = vtanh.f32 %v544_v10  ;;  %v747_v10 = vld [vmem:[%s3709_s6 + $0x8] sm:$0xff] }
  0xfe   : > { %629 = vmatmul.f32.gmra.mxu1 %v2247_v14  ;;  %677 = vmatmul.f32.gmra.mxu3 %v2902_v41  ;;  %v758_v14 = vld [vmem:[%s3709_s6 + $0x60] sm:$0xff] }
  0xff   : > { %767 = vmatpush.msrb.mxu0 %v758_v14  ;;  %2146 = vmatpush.msra.mxu2 %v758_v14 }
 0x100   : > { %2147 = vmatpush.msrb.mxu3 %v758_v14  ;;  %v548_v14 = vmul.f32 %v500_v59, %v468_v9 }
 0x101   : > { %768 = vmatpush.msrb.mxu0 %v757_v28  ;;  %2148 = vmatpush.msra.mxu2 %v757_v28 }
 0x102   : > { %2149 = vmatpush.msrb.mxu3 %v757_v28 }
 0x103   : > { %769 = vmatpush.msrb.mxu0 %v756_v29  ;;  %2150 = vmatpush.msra.mxu2 %v756_v29 }
 0x104   : > { %2151 = vmatpush.msrb.mxu3 %v756_v29 }
 0x105   : > { %770 = vmatpush.msrb.mxu0 %v755_v35  ;;  %2152 = vmatpush.msra.mxu2 %v755_v35 }
 0x106   : > { %632 = vmatmul.f32.gmra.mxu1 %v2249_v17  ;;  %680 = vmatmul.f32.gmra.mxu3 %v2906_v45  ;;  %v528_v17 = vmul.f32 %v490_v62, %v448_v7  ;;  %v750_v62 = vld [vmem:[%s3709_s6 + $0x20] sm:$0xff]  ;;  %v547_v7 = vmul.f32 %v500_v59, %v467_v58 }
 0x107   : > { %771 = vmatpush.msrb.mxu0 %v754_v38  ;;  %2154 = vmatpush.msra.mxu2 %v754_v38 }
 0x108   : > { %2282 = vtanh.f32 %v528_v17  ;;  %2153 = vmatpush.msrb.mxu3 %v755_v35  ;;  %v746_v17 = vld [vmem:[%s3709_s6] sm:$0xff]  ;;  %v3034_v35 = vadd.f32 %v2950_v15, %v2925_v61 }
 0x109   : > { %772 = vmatpush.msrb.mxu0 %v753_v44  ;;  %2156 = vmatpush.msra.mxu2 %v753_v44 }
 0x10a   : > { %2155 = vmatpush.msrb.mxu3 %v754_v38  ;;  %3723 = vst [vmem:[#allocation12_spill] sm:$0xff] %v3034_v35 }
 0x10b   : > { %773 = vmatpush.msrb.mxu0 %v752_v46  ;;  %2158 = vmatpush.msra.mxu2 %v752_v46 }
 0x10c   : > { %2157 = vmatpush.msrb.mxu3 %v753_v44 }
 0x10d   : > { %774 = vmatpush.msrb.mxu0 %v751_v48  ;;  %2160 = vmatpush.msra.mxu2 %v751_v48 }
 0x10e   : > { %635 = vmatmul.f32.gmra.mxu1 %v2251_v19  ;;  %683 = vmatmul.f32.gmra.mxu3 %v2911_v49  ;;  %v476_v19 = vrot.slane %v2843_v34, 6  ;;  %v749_v34 = vld [vmem:[%s3709_s6 + $0x18] sm:$0xff] }
 0x10f   : > { %775 = vmatpush.msrb.mxu0 %v750_v62  ;;  %2162 = vmatpush.msra.mxu2 %v750_v62 }
 0x110   : > { %2159 = vmatpush.msrb.mxu3 %v752_v46 }
 0x111   : > { %776 = vmatpush.msrb.mxu0 %v749_v34  ;;  %2164 = vmatpush.msra.mxu2 %v749_v34 }
 0x112   : > { %2161 = vmatpush.msrb.mxu3 %v751_v48 }
 0x113   : > { %777 = vmatpush.msrb.mxu0 %v748_v6  ;;  %2166 = vmatpush.msra.mxu2 %v748_v6 }
 0x114   : > { %2163 = vmatpush.msrb.mxu3 %v750_v62 }
 0x115   : > { %778 = vmatpush.msrb.mxu0 %v747_v10  ;;  %2168 = vmatpush.msra.mxu2 %v747_v10 }
 0x116   : > { %638 = vmatmul.f32.gmra.mxu1 %v2253_v21  ;;  %686 = vmatmul.f32.gmra.mxu3 %v2915_v53  ;;  %v2953_v21 = vpop.eup %2278 }
 0x117   : > { %v2974_v39 = vpop.eup %2280  ;;  %779 = vmatpush.msrb.mxu0 %v746_v17  ;;  %2170 = vmatpush.msra.mxu2 %v746_v17 }
 0x118   : > { %v2976_v42 = vpop.eup %2282  ;;  %2165 = vmatpush.msrb.mxu3 %v749_v34 }
 0x11a   : > { %2167 = vmatpush.msrb.mxu3 %v748_v6 }
 0x11c   : > { %2169 = vmatpush.msrb.mxu3 %v747_v10 }
 0x11e   : > { %641 = vmatmul.f32.gmra.mxu1 %v2257_v25  ;;  %689 = vmatmul.f32.gmra.mxu3 %v2920_v57  ;;  %v499_v25 = vperm.slane %v483_v11, 0 }
 0x11f   : > { %2171 = vmatpush.msrb.mxu3 %v746_v17 }
 0x120   : > { %v545_v36 = vmul.f32 %v499_v25, %v2958_v26  ;;  %v546_v50 = vmul.f32 %v499_v25, %v2981_v43  ;;  %v452_v25 = vld [vmem:[%s2841_s17 + $0x78] sm:$0xff] }
 0x121   : > { %v532_v29 = vmul.f32 %v492_v1, %v452_v25 }
 0x122   : > { %2284 = vtanh.f32 %v545_v36 }
 0x126   : > { %644 = vmatmul.f32.gmra.mxu1 %v2261_v31  ;;  %692 = vmatmul.f32.gmra.mxu3 %v2929_v2  ;;  %v491_v31 = vperm.slane %v476_v19, 0 }
 0x128   : > { %v529_v40 = vmul.f32 %v491_v31, %v449_v33  ;;  %v2995_v52 = vpop.eup %2284  ;;  %v530_v54 = vmul.f32 %v491_v31, %v450_v47 }
 0x129   : > { %v3047_v46 = vadd.f32 %v2995_v52, %v2958_v26 }
 0x12a   : > { %2286 = vtanh.f32 %v529_v40  ;;  %v3041_v40 = vadd.f32 %v2974_v39, %v2933_v4 }
 0x12b   : > { %2288 = vtanh.f32 %v546_v50  ;;  %3727 = vst [vmem:[#allocation16_spill] sm:$0xff] %v3047_v46 }
 0x12c   : > { %2290 = vtanh.f32 %v530_v54  ;;  %3725 = vst [vmem:[#allocation14_spill] sm:$0xff] %v3041_v40 }
 0x12d   : > { %2292 = vtanh.f32 %v533_v3 }
 0x12e   : > { %647 = vmatmul.f32.gmra.mxu1 %v2953_v21  ;;  %695 = vmatmul.f32.gmra.mxu3 %v2950_v15  ;;  %2294 = vtanh.f32 %v547_v7  ;;  %v3057_v15 = vld [vmem:[%s3708_s5] ss:$0 sm:$0xff] }
 0x12f   : > { %2296 = vtanh.f32 %v531_v60 }
 0x130   : > { %v2998_v56 = vpop.eup %2286  ;;  %2298 = vtanh.f32 %v548_v14 }
 0x131   : > { %v2289_v11 = vpop.eup %2288  ;;  %2300 = vtanh.f32 %v532_v29 }
 0x132   : > { %v3020_v63 = vpop.eup %2290  ;;  %v3037_v38 = vadd.f32 %v2289_v11, %v2981_v43 }
 0x133   : > { %v2293_v19 = vpop.eup %2292 }
 0x134   : > { %v2295_v28 = vpop.eup %2294  ;;  %v3027_v31 = vadd.f32 %v2293_v19, %v453_v0  ;;  %3724 = vst [vmem:[#allocation13_spill] sm:$0xff] %v3037_v38 }
 0x135   : > { %v3029_v33 = vpop.eup %2296  ;;  %v3043_v44 = vadd.f32 %v2295_v28, %v467_v58 }
 0x136   : > { %650 = vmatmul.f32.gmra.mxu1 %v2976_v42  ;;  %698 = vmatmul.f32.gmra.mxu3 %v2974_v39  ;;  %v2299_v36 = vpop.eup %2298 }
 0x137   : > { %3726 = vst [vmem:[#allocation15_spill] sm:$0xff] %v3043_v44  ;;  %v3049_v47 = vadd.f32 %v2299_v36, %v468_v9  ;;  %v3051_v61 = vpop.eup %2300 }
 0x139   : > { %3728 = vst [vmem:[#allocation17_spill] sm:$0xff] %v3049_v47 }
 0x13e   : > { %653 = vmatmul.f32.gmra.mxu1 %v2998_v56  ;;  %701 = vmatmul.f32.gmra.mxu3 %v2995_v52 }
 0x146   : > { %656 = vmatmul.f32.gmra.mxu1 %v3020_v63  ;;  %704 = vmatmul.f32.gmra.mxu3 %v2289_v11 }
 0x14e   : > { %659 = vmatmul.f32.gmra.mxu1 %v3029_v33  ;;  %707 = vmatmul.f32.gmra.mxu3 %v2295_v28 }
 0x156   : > { %662 = vmatmul.f32.gmra.mxu1 %v3051_v61  ;;  %710 = vmatmul.f32.gmra.mxu3 %v2299_v36 }
 0x15b   : > { %v618_v4 = vpop.f32.mrf.mxu1 }
 0x15c   : > { %v619_v39 = vadd.f32 %v3057_v15, %v618_v4 }
 0x15e   : > { %2302 = vtanh.f32 %v619_v39  ;;  %665 = vmatmul.f32.gmra.mxu1 %v2293_v19 }
 0x163   : > { %v621_v43 = vpop.f32.mrf.mxu1 }
 0x164   : > { %v2303_v26 = vpop.eup %2302  ;;  %v622_v48 = vadd.f32 %v3057_v15, %v621_v43 }
 0x165   : > { %780 = vmatmul.f32.vlgmr.msrb.gmra.mxu0 %v2303_v26 }
 0x166   : > { %2304 = vtanh.f32 %v622_v48 }
 0x169   : > { %v3061_v50 = vpop.f32.mrf.mxu3 }
 0x16b   : > { %v624_v51 = vpop.f32.mrf.mxu1 }
 0x16c   : > { %v2305_v52 = vpop.eup %2304  ;;  %v625_v54 = vadd.f32 %v3057_v15, %v624_v51 }
 0x16d   : > { %783 = vmatmul.f32.gmra.mxu0 %v2305_v52 }
 0x16e   : > { %2306 = vtanh.f32 %v625_v54 }
 0x171   : > { %v3064_v55 = vpop.f32.mrf.mxu3 }
 0x173   : > { %v627_v58 = vpop.f32.mrf.mxu1 }
 0x174   : > { %v2307_v59 = vpop.eup %2306  ;;  %v628_v62 = vadd.f32 %v3057_v15, %v627_v58 }
 0x175   : > { %786 = vmatmul.f32.gmra.mxu0 %v2307_v59 }
 0x176   : > { %2308 = vtanh.f32 %v628_v62 }
 0x179   : > { %v3067_v0 = vpop.f32.mrf.mxu3 }
 0x17b   : > { %v630_v34 = vpop.f32.mrf.mxu1 }
 0x17c   : > { %v2309_v1 = vpop.eup %2308  ;;  %v631_v3 = vadd.f32 %v3057_v15, %v630_v34 }
 0x17d   : > { %789 = vmatmul.f32.gmra.mxu0 %v2309_v1 }
 0x17e   : > { %2310 = vtanh.f32 %v631_v3 }
 0x181   : > { %v3070_v5 = vpop.f32.mrf.mxu3 }
 0x183   : > { %v633_v6 = vpop.f32.mrf.mxu1 }
 0x184   : > { %v2311_v7 = vpop.eup %2310  ;;  %v634_v9 = vadd.f32 %v3057_v15, %v633_v6 }
 0x185   : > { %792 = vmatmul.f32.gmra.mxu0 %v2311_v7 }
 0x186   : > { %2312 = vtanh.f32 %v634_v9 }
 0x189   : > { %v3073_v10 = vpop.f32.mrf.mxu3 }
 0x18b   : > { %v636_v11 = vpop.f32.mrf.mxu1 }
 0x18c   : > { %v2313_v60 = vpop.eup %2312  ;;  %v637_v14 = vadd.f32 %v3057_v15, %v636_v11 }
 0x18d   : > { %795 = vmatmul.f32.gmra.mxu0 %v2313_v60 }
 0x18e   : > { %2314 = vtanh.f32 %v637_v14 }
 0x191   : > { %v3076_v17 = vpop.f32.mrf.mxu3 }
 0x193   : > { %v639_v19 = vpop.f32.mrf.mxu1 }
 0x194   : > { %v2315_v25 = vpop.eup %2314  ;;  %v640_v28 = vadd.f32 %v3057_v15, %v639_v19 }
 0x195   : > { %798 = vmatmul.f32.gmra.mxu0 %v2315_v25 }
 0x196   : > { %2316 = vtanh.f32 %v640_v28 }
 0x199   : > { %v3079_v29 = vpop.f32.mrf.mxu3 }
 0x19b   : > { %v642_v36 = vpop.f32.mrf.mxu1 }
 0x19c   : > { %v2317_v4 = vpop.eup %2316  ;;  %v643_v39 = vadd.f32 %v3057_v15, %v642_v36 }
 0x19d   : > { %801 = vmatmul.f32.gmra.mxu0 %v2317_v4 }
 0x19e   : > { %2318 = vtanh.f32 %v643_v39 }
 0x1a1   : > { %v3082_v43 = vpop.f32.mrf.mxu3 }
 0x1a3   : > { %v645_v26 = vpop.f32.mrf.mxu1 }
 0x1a4   : > { %v2319_v48 = vpop.eup %2318  ;;  %v646_v51 = vadd.f32 %v3057_v15, %v645_v26 }
 0x1a5   : > { %804 = vmatmul.f32.gmra.mxu0 %v2319_v48 }
 0x1a6   : > { %2320 = vtanh.f32 %v646_v51 }
 0x1a9   : > { %v3085_v52 = vpop.f32.mrf.mxu3 }
 0x1ab   : > { %v648_v54 = vpop.f32.mrf.mxu1 }
 0x1ac   : > { %v2321_v58 = vpop.eup %2320  ;;  %v649_v59 = vadd.f32 %v3057_v15, %v648_v54 }
 0x1ad   : > { %807 = vmatmul.f32.gmra.mxu0 %v2321_v58 }
 0x1ae   : > { %2322 = vtanh.f32 %v649_v59 }
 0x1b1   : > { %v3088_v62 = vpop.f32.mrf.mxu3 }
 0x1b3   : > { %v651_v34 = vpop.f32.mrf.mxu1 }
 0x1b4   : > { %v2323_v1 = vpop.eup %2322  ;;  %v652_v3 = vadd.f32 %v3057_v15, %v651_v34 }
 0x1b5   : > { %810 = vmatmul.f32.gmra.mxu0 %v2323_v1 }
 0x1b6   : > { %2324 = vtanh.f32 %v652_v3 }
 0x1b9   : > { %v3091_v6 = vpop.f32.mrf.mxu3 }
 0x1bb   : > { %v654_v7 = vpop.f32.mrf.mxu1 }
 0x1bc   : > { %v2325_v9 = vpop.eup %2324  ;;  %v655_v11 = vadd.f32 %v3057_v15, %v654_v7 }
 0x1bd   : > { %813 = vmatmul.f32.gmra.mxu0 %v2325_v9 }
 0x1be   : > { %2326 = vtanh.f32 %v655_v11 }
 0x1c1   : > { %v3094_v60 = vpop.f32.mrf.mxu3 }
 0x1c3   : > { %v657_v14 = vpop.f32.mrf.mxu1 }
 0x1c4   : > { %v2327_v19 = vpop.eup %2326  ;;  %v658_v25 = vadd.f32 %v3057_v15, %v657_v14  ;;  %v670_v14 = vadd.f32 %v3057_v15, %v3061_v50  ;;  %v673_v50 = vadd.f32 %v3057_v15, %v3064_v55  ;;  %v676_v55 = vadd.f32 %v3057_v15, %v3067_v0 }
 0x1c5   : > { %816 = vmatmul.f32.gmra.mxu0 %v2327_v19 }
 0x1c6   : > { %2328 = vtanh.f32 %v658_v25 }
 0x1c9   : > { %v3097_v28 = vpop.f32.mrf.mxu3 }
 0x1cb   : > { %v660_v36 = vpop.f32.mrf.mxu1 }
 0x1cc   : > { %v2329_v4 = vpop.eup %2328  ;;  %v661_v39 = vadd.f32 %v3057_v15, %v660_v36  ;;  %v3106_v36 = vstv %s762_s24  ;;  %s2557_s24 = scalar_lea.hbm %s3711_s8, 32 }
 0x1cd   : > { %819 = vmatmul.f32.vlgmr.msra.gmra.mxu2 %v2329_v4 }
 0x1ce   : > { %2330 = vtanh.f32 %v661_v39  ;;  %v877_v39 = vld [vmem:[%s3113_s15] sm:$0xff] }
 0x1d1   : > { %v708_v26 = vpop.f32.mrf.mxu3 }
 0x1d2   : > { %v709_v48 = vadd.f32 %v3057_v15, %v708_v26 }
 0x1d3   : > { %v663_v51 = vpop.f32.mrf.mxu1 }
 0x1d4   : > { %v2331_v54 = vpop.eup %2330  ;;  %2332 = vtanh.f32 %v709_v48  ;;  %v664_v58 = vadd.f32 %v3057_v15, %v663_v51  ;;  %v878_v48 = vld [vmem:[%s3113_s15 + $0x8] sm:$0xff] }
 0x1d5   : > { %822 = vmatmul.f32.gmra.mxu2 %v2331_v54 }
 0x1d6   : > { %2334 = vtanh.f32 %v664_v58 }
 0x1d9   : > { %v711_v59 = vpop.f32.mrf.mxu3 }
 0x1da   : > { %v2333_v34 = vpop.eup %2332  ;;  %v712_v1 = vadd.f32 %v3057_v15, %v711_v59 }
 0x1db   : > { %v666_v3 = vpop.f32.mrf.mxu1  ;;  %870 = vmatmul.f32.vlgmr.msrb.gmra.mxu3 %v2333_v34 }
 0x1dc   : > { %v2335_v7 = vpop.eup %2334  ;;  %2336 = vtanh.f32 %v712_v1  ;;  %v667_v9 = vadd.f32 %v3057_v15, %v666_v3 }
 0x1dd   : > { %825 = vmatmul.f32.gmra.mxu2 %v2335_v7 }
 0x1de   : > { %2338 = vtanh.f32 %v667_v9 }
 0x1df   : > { %2340 = vtanh.f32 %v670_v14 }
 0x1e0   : > { %2342 = vtanh.f32 %v673_v50  ;;  %v679_v50 = vadd.f32 %v3057_v15, %v3070_v5 }
 0x1e1   : > { %2344 = vtanh.f32 %v676_v55 }
 0x1e2   : > { %v2337_v11 = vpop.eup %2336  ;;  %v781_v19 = vpop.f32.mrf.mxu0  ;;  %2346 = vtanh.f32 %v679_v50 }
 0x1e3   : > { %873 = vmatmul.f32.gmra.mxu3 %v2337_v11  ;;  %v782_v4 = vadd.f32 %v781_v19, %v3106_v36 }
 0x1e4   : > { %v2339_v25 = vpop.eup %2338 }
 0x1e5   : > { %828 = vmatmul.f32.gmra.mxu2 %v2339_v25  ;;  %v909_v51 = vadd.f32 %v877_v39, %v782_v4  ;;  %v2341_v58 = vpop.eup %2340  ;;  %v879_v39 = vld [vmem:[%s3113_s15 + $0x10] sm:$0xff] }
 0x1e6   : > { %v2343_v11 = vpop.eup %2342 }
 0x1e7   : > { %v942_v34 = vsel %vm941_vm0, %v909_v51, -inf }
 0x1ea   : > { %v784_v26 = vpop.f32.mrf.mxu0 }
 0x1eb   : > { %v785_v54 = vadd.f32 %v784_v26, %v3106_v36 }
 0x1ed   : > { %v910_v59 = vadd.f32 %v878_v48, %v785_v54  ;;  %831 = vmatmul.f32.gmra.mxu2 %v2341_v58  ;;  %v880_v54 = vld [vmem:[%s3113_s15 + $0x18] sm:$0xff] }
 0x1ef   : > { %v943_v1 = vsel %vm941_vm0, %v910_v59, -inf }
 0x1f0   : > { %v944_v3 = vmax.f32 %v942_v34, %v943_v1  ;;  %v2345_v34 = vpop.eup %2344 }
 0x1f2   : > { %v945_v7 = vrot.slane %v944_v3, 4  ;;  %v787_v9 = vpop.f32.mrf.mxu0 }
 0x1f3   : > { %v788_v25 = vadd.f32 %v787_v9, %v3106_v36 }
 0x1f4   : > { %v946_v14 = vmax.f32 %v944_v3, %v945_v7 }
 0x1f5   : > { %834 = vmatmul.f32.gmra.mxu2 %v2343_v11  ;;  %v911_v58 = vadd.f32 %v879_v39, %v788_v25 }
 0x1f6   : > { %v947_v19 = vrot.slane %v946_v14, 2 }
 0x1f7   : > { %v951_v7 = vsel %vm941_vm0, %v911_v58, -inf }
 0x1f8   : > { %v948_v4 = vmax.f32 %v946_v14, %v947_v19  ;;  %v682_v19 = vadd.f32 %v3057_v15, %v3073_v10 }
 0x1fa   : > { %v949_v26 = vrot.slane %v948_v4, 1  ;;  %v790_v48 = vpop.f32.mrf.mxu0 }
 0x1fb   : > { %v791_v0 = vadd.f32 %v790_v48, %v3106_v36 }
 0x1fc   : > { %v950_v1 = vmax.f32 %v948_v4, %v949_v26  ;;  %v2347_v4 = vpop.eup %2346 }
 0x1fd   : > { %v912_v47 = vadd.f32 %v880_v54, %v791_v0  ;;  %837 = vmatmul.f32.gmra.mxu2 %v2345_v34  ;;  %v881_v54 = vld [vmem:[%s3113_s15 + $0x20] sm:$0xff]  ;;  %v685_v34 = vadd.f32 %v3057_v15, %v3076_v17 }
 0x1fe   : > { %v1086_v3 = vsub.f32 %v909_v51, %v950_v1  ;;  %v1087_v55 = vsub.f32 %v910_v59, %v950_v1 }
 0x1ff   : > { %v952_v9 = vsel %vm941_vm0, %v912_v47, -inf }
 0x200   : > { %v1120_v11 = vmul.f32 1.442695, %v1087_v55  ;;  %v953_v5 = vmax.f32 %v951_v7, %v952_v9  ;;  %v1118_v14 = vmul.f32 1.442695, %v1086_v3  ;;  %v882_v55 = vld [vmem:[%s3113_s15 + $0x28] sm:$0xff] }
 0x202   : > { %2348 = vpow2.f32 %v1120_v11  ;;  %v954_v25 = vrot.slane %v953_v5, 4  ;;  %v793_v39 = vpop.f32.mrf.mxu0 }
 0x203   : > { %2350 = vpow2.f32 %v1118_v14  ;;  %v794_v59 = vadd.f32 %v793_v39, %v3106_v36 }
 0x204   : > { %v955_v50 = vmax.f32 %v953_v5, %v954_v25  ;;  %2352 = vtanh.f32 %v682_v19 }
 0x205   : > { %840 = vmatmul.f32.gmra.mxu2 %v2347_v4  ;;  %v3148_v9 = vadd.f32 %v881_v54, %v794_v59  ;;  %2354 = vtanh.f32 %v685_v34 }
 0x206   : > { %v956_v51 = vrot.slane %v955_v50, 2 }
 0x207   : > { %v960_v17 = vsel %vm941_vm0, %v3148_v9, -inf }
 0x208   : > { %v3136_v26 = vpop.eup %2348  ;;  %v957_v48 = vmax.f32 %v955_v50, %v956_v51 }
 0x209   : > { %v3139_v0 = vpop.eup %2350  ;;  %v1183_v10 = vsel %vm941_vm0, %v3136_v26, 0.0 }
 0x20a   : > { %v958_v1 = vrot.slane %v957_v48, 1  ;;  %v796_v3 = vpop.f32.mrf.mxu0  ;;  %v1182_v7 = vsel %vm941_vm0, %v3139_v0, 0.0  ;;  %v2353_v14 = vpop.eup %2352 }
 0x20b   : > { %v797_v11 = vadd.f32 %v796_v3, %v3106_v36  ;;  %v1184_v5 = vadd.f32 %v1183_v10, %v1182_v7  ;;  %v688_v10 = vadd.f32 %v3057_v15, %v3079_v29 }
 0x20c   : > { %v959_v19 = vmax.f32 %v957_v48, %v958_v1 }
 0x20d   : > { %v914_v25 = vadd.f32 %v882_v55, %v797_v11  ;;  %843 = vmatmul.f32.gmra.mxu2 %v2353_v14  ;;  %v1185_v39 = vrot.slane %v1184_v5, 4  ;;  %v883_v14 = vld [vmem:[%s3113_s15 + $0x30] sm:$0xff] }
 0x20e   : > { %v1088_v4 = vsub.f32 %v911_v58, %v959_v19  ;;  %v1089_v50 = vsub.f32 %v912_v47, %v959_v19  ;;  %v2355_v47 = vpop.eup %2354 }
 0x20f   : > { %v961_v51 = vsel %vm941_vm0, %v914_v25, -inf  ;;  %v1186_v44 = vadd.f32 %v1185_v39, %v1184_v5 }
 0x210   : > { %v1124_v46 = vmul.f32 1.442695, %v1089_v50  ;;  %v962_v59 = vmax.f32 %v960_v17, %v961_v51  ;;  %v1122_v54 = vmul.f32 1.442695, %v1088_v4  ;;  %v884_v4 = vld [vmem:[%s3113_s15 + $0x38] sm:$0xff] }
 0x211   : > { %v1187_v38 = vrot.slane %v1186_v44, 2 }
 0x212   : > { %2356 = vpow2.f32 %v1124_v46  ;;  %v963_v48 = vrot.slane %v962_v59, 4  ;;  %v799_v1 = vpop.f32.mrf.mxu0 }
 0x213   : > { %v1188_v34 = vadd.f32 %v1187_v38, %v1186_v44  ;;  %2358 = vpow2.f32 %v1122_v54  ;;  %v800_v7 = vadd.f32 %v799_v1, %v3106_v36  ;;  %v691_v44 = vadd.f32 %v3057_v15, %v3082_v43 }
 0x214   : > { %v964_v58 = vmax.f32 %v962_v59, %v963_v48  ;;  %2360 = vtanh.f32 %v688_v10  ;;  %v2612_v1 = vmov 0  }
 0x215   : > { %846 = vmatmul.f32.gmra.mxu2 %v2355_v47  ;;  %v1189_v3 = vrot.slane %v1188_v34, 1  ;;  %v3172_v17 = vadd.f32 %v883_v14, %v800_v7  ;;  %2234 = vset.pattern.permute.xlu0 %v2612_v1 }
 0x216   : > { %v965_v55 = vrot.slane %v964_v58, 2  ;;  %2235 = vset.pattern.permute.xlu1 %v2612_v1  ;;  %2236 = vset.pattern.permute.xlu2 %v2612_v1 }
 0x217   : > { %v3157_v11 = vadd.f32 %v1189_v3, %v1188_v34  ;;  %v969_v3 = vsel %vm941_vm0, %v3172_v17, -inf }
 0x218   : > { %v3159_v5 = vpop.eup %2356  ;;  %v966_v29 = vmax.f32 %v964_v58, %v965_v55 }
 0x219   : > { %v3162_v46 = vpop.eup %2358  ;;  %v1192_v38 = vsel %vm941_vm0, %v3159_v5, 0.0  ;;  %2362 = vrcp.f32 %v3157_v11  ;;  %v1335_v1 = vand.u32 2147483647, %v3157_v11  ;;  %vm1331_vm2 = vweird.f32 %v3157_v11 }
 0x21a   : > { %v967_v19 = vrot.slane %v966_v29, 1  ;;  %v802_v39 = vpop.f32.mrf.mxu0  ;;  %v1191_v50 = vsel %vm941_vm0, %v3162_v46, 0.0  ;;  %v2361_v54 = vpop.eup %2360  ;;  %2364 = vtanh.f32 %v691_v44 }
 0x21b   : > { %v803_v51 = vadd.f32 %v802_v39, %v3106_v36  ;;  %v1193_v59 = vadd.f32 %v1192_v38, %v1191_v50  ;;  %v1337_v50 = vand.u32 2147483648, %v3157_v11  ;;  %vm1336_vm4 = vcmp.eq.f32.partialorder %v1335_v1, 8.507059e+37 }
 0x21c   : > { %v968_v10 = vmax.f32 %v966_v29, %v967_v19 }
 0x21d   : > { %v3175_v48 = vadd.f32 %v884_v4, %v803_v51  ;;  %849 = vmatmul.f32.gmra.mxu2 %v2361_v54  ;;  %v1194_v34 = vrot.slane %v1193_v59, 4 }
 0x21e   : > { %v1090_v43 = vsub.f32 %v3148_v9, %v968_v10  ;;  %v1091_v47 = vsub.f32 %v914_v25, %v968_v10  ;;  %v694_v9 = vadd.f32 %v3057_v15, %v3085_v52 }
 0x21f   : > { %v2363_v58 = vpop.eup %2362  ;;  %v970_v55 = vsel %vm941_vm0, %v3175_v48, -inf  ;;  %v1195_v7 = vadd.f32 %v1194_v34, %v1193_v59 }
 0x220   : > { %v1128_v29 = vmul.f32 1.442695, %v1091_v47  ;;  %v971_v14 = vmax.f32 %v969_v3, %v970_v55  ;;  %v1327_v38 = vmul.f32 %v2363_v58, %v3157_v11  ;;  %v1126_v39 = vmul.f32 1.442695, %v1090_v43  ;;  %v2365_v54 = vpop.eup %2364 }
 0x221   : > { %v1196_v19 = vrot.slane %v1195_v7, 2  ;;  %vm1332_vm1 = vweird.f32 %v2363_v58  ;;  %v1338_v3 = vor.u32 1.1754944e-38, %v1337_v50  ;;  %v697_v11 = vadd.f32 %v3057_v15, %v3088_v62 }
 0x222   : > { %2366 = vpow2.f32 %v1128_v29  ;;  %v972_v25 = vrot.slane %v971_v14, 4  ;;  %v805_v44 = vpop.f32.mrf.mxu0  ;;  %v1328_v4 = vsub.f32 1.0, %v1327_v38  ;;  %vm1333_vm3 = vmor %vm1331_vm2, %vm1332_vm1 }
 0x223   : > { %v1197_v51 = vadd.f32 %v1196_v19, %v1195_v7  ;;  %2368 = vpow2.f32 %v1126_v39  ;;  %v806_v47 = vadd.f32 %v805_v44, %v3106_v36 }
 0x224   : > { %v973_v10 = vmax.f32 %v971_v14, %v972_v25  ;;  %v1329_v59 = vmul.f32 %v2363_v58, %v1328_v4  ;;  %2370 = vtanh.f32 %v694_v9  ;;  %v885_v14 = vld [vmem:[%s3113_s15 + $0x40] sm:$0xff]  ;;  %v886_v4 = vld [vmem:[%s3113_s15 + $0x48] sm:$0xff] }
 0x225   : > { %852 = vmatmul.f32.gmra.mxu2 %v2365_v54  ;;  %v1198_v34 = vrot.slane %v1197_v51, 1 }
 0x226   : > { %v974_v43 = vrot.slane %v973_v10, 2  ;;  %v1330_v52 = vadd.f32 %v2363_v58, %v1329_v59 }
 0x227   : > { %v3189_v55 = vadd.f32 %v1198_v34, %v1197_v51  ;;  %v3203_v51 = vadd.f32 %v885_v14, %v806_v47 }
 0x228   : > { %v3191_v7 = vpop.eup %2366  ;;  %v975_v29 = vmax.f32 %v973_v10, %v974_v43  ;;  %v1334_v38 = vsel %vm1333_vm3, %v2363_v58, %v1330_v52 }
 0x229   : > { %v3194_v19 = vpop.eup %2368  ;;  %v1201_v39 = vsel %vm941_vm0, %v3191_v7, 0.0  ;;  %v1339_v9 = vsel %vm1336_vm4, %v1338_v3, %v1334_v38  ;;  %2372 = vrcp.f32 %v3189_v55  ;;  %v978_v47 = vsel %vm941_vm0, %v3203_v51, -inf }
 0x22a   : > { %v976_v25 = vrot.slane %v975_v29, 1  ;;  %v808_v44 = vpop.f32.mrf.mxu0  ;;  %v1340_v50 = vmul.f32 %v3139_v0, %v1339_v9  ;;  %v1200_v54 = vsel %vm941_vm0, %v3194_v19, 0.0  ;;  %v2371_v10 = vpop.eup %2370  ;;  %2374 = vtanh.f32 %v697_v11 }
 0x22b   : > { %v809_v58 = vadd.f32 %v808_v44, %v3106_v36  ;;  %v1202_v1 = vadd.f32 %v1201_v39, %v1200_v54  ;;  %v700_v11 = vadd.f32 %v3057_v15, %v3091_v6  ;;  %vm1347_vm6 = vweird.f32 %v3189_v55 }
 0x22c   : > { %v977_v59 = vmax.f32 %v975_v29, %v976_v25  ;;  %1616 = vperm.xlu0 %2234, %v1340_v50   ;;  %v1353_v50 = vand.u32 2147483648, %v3189_v55 }
 0x22d   : > { %v3208_v34 = vadd.f32 %v886_v4, %v809_v58  ;;  %855 = vmatmul.f32.gmra.mxu2 %v2371_v10  ;;  %v1203_v0 = vrot.slane %v1202_v1, 4 }
 0x22e   : > { %v1092_v62 = vsub.f32 %v3172_v17, %v977_v59  ;;  %v1093_v43 = vsub.f32 %v3175_v48, %v977_v59  ;;  %v1341_v48 = vmul.f32 %v3136_v26, %v1339_v9  ;;  %v1354_v9 = vor.u32 1.1754944e-38, %v1353_v50 }
 0x22f   : > { %v2373_v52 = vpop.eup %2372  ;;  %v979_v3 = vsel %vm941_vm0, %v3208_v34, -inf  ;;  %v1204_v25 = vadd.f32 %v1203_v0, %v1202_v1 }
 0x230   : > { %v1130_v14 = vmul.f32 1.442695, %v1092_v62  ;;  %v1132_v29 = vmul.f32 1.442695, %v1093_v43  ;;  %v980_v38 = vmax.f32 %v978_v47, %v979_v3  ;;  %v1343_v39 = vmul.f32 %v2373_v52, %v3189_v55  ;;  %v2375_v54 = vpop.eup %2374 }
 0x231   : > { %v1205_v58 = vrot.slane %v1204_v25, 2  ;;  %vm1348_vm5 = vweird.f32 %v2373_v52  ;;  %v1351_v62 = vand.u32 2147483647, %v3189_v55  ;;  %v703_v55 = vadd.f32 %v3057_v15, %v3094_v60 }
 0x232   : > { %2376 = vpow2.f32 %v1130_v14  ;;  %v981_v17 = vrot.slane %v980_v38, 4  ;;  %v811_v44 = vpop.f32.mrf.mxu0  ;;  %v1344_v4 = vsub.f32 1.0, %v1343_v39  ;;  %vm1349_vm7 = vmor %vm1347_vm6, %vm1348_vm5  ;;  %v887_v14 = vld [vmem:[%s3113_s15 + $0x50] sm:$0xff] }
 0x233   : > { %2378 = vpow2.f32 %v1132_v29  ;;  %v1206_v6 = vadd.f32 %v1205_v58, %v1204_v25  ;;  %v812_v26 = vadd.f32 %v811_v44, %v3106_v36  ;;  %vm1352_vm8 = vcmp.eq.f32.partialorder %v1351_v62, 8.507059e+37 }
 0x234   : > { %v982_v10 = vmax.f32 %v980_v38, %v981_v17  ;;  %1621 = vperm.xlu0 %2234, %v1341_v48   ;;  %v1345_v59 = vmul.f32 %v2373_v52, %v1344_v4  ;;  %2380 = vtanh.f32 %v700_v11  ;;  %v888_v4 = vld [vmem:[%s3113_s15 + $0x58] sm:$0xff] }
 0x235   : > { %858 = vmatmul.f32.gmra.mxu2 %v2375_v54  ;;  %v1207_v0 = vrot.slane %v1206_v6, 1  ;;  %v3237_v58 = vadd.f32 %v887_v14, %v812_v26 }
 0x236   : > { %v983_v1 = vrot.slane %v982_v10, 2  ;;  %v1346_v43 = vadd.f32 %v2373_v52, %v1345_v59 }
 0x237   : > { %v1208_v25 = vadd.f32 %v1207_v0, %v1206_v6 }
 0x238   : > { %v3224_v47 = vpop.eup %2376  ;;  %v984_v3 = vmax.f32 %v982_v10, %v983_v1  ;;  %v1350_v29 = vsel %vm1349_vm7, %v2373_v52, %v1346_v43 }
 0x239   : > { %v3227_v38 = vpop.eup %2378  ;;  %v1209_v39 = vsel %vm941_vm0, %v3224_v47, 0.0  ;;  %v1355_v11 = vsel %vm1352_vm8, %v1354_v9, %v1350_v29  ;;  %2382 = vrcp.f32 %v1208_v25  ;;  %vm1363_vm10 = vweird.f32 %v1208_v25 }
 0x23a   : > { %v1210_v17 = vsel %vm941_vm0, %v3227_v38, 0.0  ;;  %v985_v48 = vrot.slane %v984_v3, 1  ;;  %v814_v44 = vpop.f32.mrf.mxu0  ;;  %v1356_v50 = vmul.f32 %v3162_v46, %v1355_v11  ;;  %v2381_v10 = vpop.eup %2380  ;;  %2384 = vtanh.f32 %v703_v55 }
 0x23b   : > { %v1211_v52 = vadd.f32 %v1210_v17, %v1209_v39  ;;  %v815_v54 = vadd.f32 %v814_v44, %v3106_v36  ;;  %v987_v46 = vsel %vm941_vm0, %v3237_v58, -inf }
 0x23c   : > { %v986_v59 = vmax.f32 %v984_v3, %v985_v48  ;;  %1626 = vperm.xlu1 %2235, %v1356_v50   ;;  %v706_v3 = vadd.f32 %v3057_v15, %v3097_v28  ;;  %v1367_v15 = vand.u32 2147483647, %v1208_v25 }
 0x23d   : > { %v1212_v62 = vrot.slane %v1211_v52, 4  ;;  %v920_v6 = vadd.f32 %v888_v4, %v815_v54  ;;  %861 = vmatmul.f32.gmra.mxu2 %v2381_v10 }
 0x23e   : > { %v1094_v60 = vsub.f32 %v3203_v51, %v986_v59  ;;  %v1095_v1 = vsub.f32 %v3208_v34, %v986_v59  ;;  %v1357_v51 = vmul.f32 %v3159_v5, %v1355_v11  ;;  %vm1368_vm12 = vcmp.eq.f32.partialorder %v1367_v15, 8.507059e+37 }
 0x23f   : > { %v1213_v43 = vadd.f32 %v1212_v62, %v1211_v52  ;;  %v988_v26 = vsel %vm941_vm0, %v920_v6, -inf  ;;  %v2383_v29 = vpop.eup %2382  ;;  %v1369_v52 = vand.u32 2147483648, %v1208_v25 }
 0x240   : > { %v1134_v9 = vmul.f32 1.442695, %v1094_v60  ;;  %v1136_v0 = vmul.f32 1.442695, %v1095_v1  ;;  %v989_v14 = vmax.f32 %v987_v46, %v988_v26  ;;  %v1359_v17 = vmul.f32 %v2383_v29, %v1208_v25  ;;  %v2385_v48 = vpop.eup %2384 }
 0x241   : > { %v1214_v39 = vrot.slane %v1213_v43, 2  ;;  %vm1364_vm9 = vweird.f32 %v2383_v29  ;;  %v1370_v1 = vor.u32 1.1754944e-38, %v1369_v52 }
 0x242   : > { %2386 = vpow2.f32 %v1134_v9  ;;  %v990_v55 = vrot.slane %v989_v14, 4  ;;  %v1360_v4 = vsub.f32 1.0, %v1359_v17  ;;  %vm1365_vm11 = vmor %vm1363_vm10, %vm1364_vm9  ;;  %v817_v26 = vpop.f32.mrf.mxu0 }
 0x243   : > { %v1215_v34 = vadd.f32 %v1214_v39, %v1213_v43  ;;  %2388 = vpow2.f32 %v1136_v0 }
 0x244   : > { %v991_v44 = vmax.f32 %v989_v14, %v990_v55  ;;  %1631 = vperm.xlu1 %2235, %v1357_v51   ;;  %2390 = vtanh.f32 %v706_v3  ;;  %v1361_v10 = vmul.f32 %v2383_v29, %v1360_v4  ;;  %v818_v51 = vadd.f32 %v817_v26, %v3106_v36 }
 0x245   : > { %v1216_v50 = vrot.slane %v1215_v34, 1  ;;  %864 = vmatmul.f32.gmra.mxu2 %v2385_v48  ;;  %v889_v48 = vld [vmem:[%s3113_s15 + $0x60] sm:$0xff] }
 0x246   : > { %v992_v54 = vrot.slane %v991_v44, 2  ;;  %v1362_v5 = vadd.f32 %v2383_v29, %v1361_v10 }
 0x247   : > { %v1217_v28 = vadd.f32 %v1216_v50, %v1215_v34 }
 0x248   : > { %v3248_v59 = vpop.eup %2386  ;;  %v993_v62 = vmax.f32 %v991_v44, %v992_v54  ;;  %v1366_v9 = vsel %vm1365_vm11, %v2383_v29, %v1362_v5  ;;  %v890_v54 = vld [vmem:[%s3113_s15 + $0x68] sm:$0xff] }
 0x249   : > { %v3250_v11 = vpop.eup %2388  ;;  %2392 = vrcp.f32 %v1217_v28  ;;  %v1218_v60 = vsel %vm941_vm0, %v3248_v59, 0.0  ;;  %v1371_v25 = vsel %vm1368_vm12, %v1370_v1, %v1366_v9  ;;  %vm1379_vm14 = vweird.f32 %v1217_v28 }
 0x24a   : > { %v1219_v43 = vsel %vm941_vm0, %v3250_v11, 0.0  ;;  %v994_v46 = vrot.slane %v993_v62, 1  ;;  %v2391_v0 = vpop.eup %2390  ;;  %v1372_v39 = vmul.f32 %v3194_v19, %v1371_v25  ;;  %v1373_v1 = vmul.f32 %v3191_v7, %v1371_v25 }
 0x24b   : > { %v1220_v14 = vadd.f32 %v1219_v43, %v1218_v60 }
 0x24c   : > { %v995_v3 = vmax.f32 %v993_v62, %v994_v46  ;;  %1636 = vperm.xlu2 %2236, %v1372_v39   ;;  %v3261_v62 = vadd.f32 %v889_v48, %v818_v51  ;;  %v1383_v46 = vand.u32 2147483647, %v1217_v28 }
 0x24d   : > { %v1221_v55 = vrot.slane %v1220_v14, 4  ;;  %867 = vmatmul.f32.gmra.mxu2 %v2391_v0 }
 0x24e   : > { %v1096_v17 = vsub.f32 %v3237_v58, %v995_v3  ;;  %v1097_v34 = vsub.f32 %v920_v6, %v995_v3  ;;  %v1385_v6 = vand.u32 2147483648, %v1217_v28  ;;  %v996_v9 = vsel %vm941_vm0, %v3261_v62, -inf }
 0x24f   : > { %v2393_v44 = vpop.eup %2392  ;;  %v1222_v4 = vadd.f32 %v1221_v55, %v1220_v14  ;;  %vm1384_vm1 = vcmp.eq.f32.partialorder %v1383_v46, 8.507059e+37  ;;  %v892_v46 = vld [vmem:[%s3113_s15 + $0x78] sm:$0xff] }
 0x250   : > { %v1138_v29 = vmul.f32 1.442695, %v1096_v17  ;;  %v1140_v50 = vmul.f32 1.442695, %v1097_v34  ;;  %v820_v52 = vpop.f32.mrf.mxu2  ;;  %v1375_v10 = vmul.f32 %v2393_v44, %v1217_v28  ;;  %vm1380_vm13 = vweird.f32 %v2393_v44 }
 0x251   : > { %v1223_v15 = vrot.slane %v1222_v4, 2  ;;  %v821_v19 = vadd.f32 %v820_v52, %v3106_v36  ;;  %vm1381_vm15 = vmor %vm1379_vm14, %vm1380_vm13  ;;  %v1386_v55 = vor.u32 1.1754944e-38, %v1385_v6 }
 0x252   : > { %2394 = vpow2.f32 %v1138_v29  ;;  %v1376_v5 = vsub.f32 1.0, %v1375_v10 }
 0x253   : > { %v1224_v60 = vadd.f32 %v1223_v15, %v1222_v4  ;;  %2396 = vpow2.f32 %v1140_v50  ;;  %v922_v58 = vadd.f32 %v890_v54, %v821_v19 }
 0x254   : > { %v1377_v43 = vmul.f32 %v2393_v44, %v1376_v5  ;;  %1641 = vperm.xlu2 %2236, %v1373_v1   ;;  %v891_v5 = vld [vmem:[%s3113_s15 + $0x70] sm:$0xff] }
 0x255   : > { %v1225_v26 = vrot.slane %v1224_v60, 1  ;;  %v997_v0 = vsel %vm941_vm0, %v922_v58, -inf }
 0x256   : > { %v998_v14 = vmax.f32 %v996_v9, %v997_v0  ;;  %v1378_v3 = vadd.f32 %v2393_v44, %v1377_v43 }
 0x257   : > { %v1226_v39 = vadd.f32 %v1225_v26, %v1224_v60 }
 0x258   : > { %v3268_v51 = vpop.eup %2394  ;;  %v999_v17 = vrot.slane %v998_v14, 4  ;;  %v823_v7 = vpop.f32.mrf.mxu2  ;;  %v1382_v25 = vsel %vm1381_vm15, %v2393_v44, %v1378_v3 }
 0x259   : > { %v3270_v34 = vpop.eup %2396  ;;  %2398 = vrcp.f32 %v1226_v39  ;;  %v1227_v48 = vsel %vm941_vm0, %v3268_v51, 0.0  ;;  %v1387_v4 = vsel %vm1384_vm1, %v1386_v55, %v1382_v25  ;;  %v824_v15 = vadd.f32 %v823_v7, %v3106_v36 }
 0x25a   : > { %v1228_v28 = vsel %vm941_vm0, %v3270_v34, 0.0  ;;  %v1000_v29 = vmax.f32 %v998_v14, %v999_v17  ;;  %v1389_v50 = vmul.f32 %v3227_v38, %v1387_v4  ;;  %v1388_v52 = vmul.f32 %v3224_v47, %v1387_v4 }
 0x25b   : > { %v1229_v54 = vadd.f32 %v1228_v28, %v1227_v48  ;;  %v3281_v0 = vadd.f32 %v891_v5, %v824_v15  ;;  %v1399_v7 = vand.u32 2147483647, %v1226_v39  ;;  %v1401_v25 = vand.u32 2147483648, %v1226_v39 }
 0x25c   : > { %v1001_v44 = vrot.slane %v1000_v29, 2  ;;  %1651 = vperm.xlu1 %2235, %v1389_v50   ;;  %1646 = vperm.xlu0 %2234, %v1388_v52   ;;  %vm1395_vm3 = vweird.f32 %v1226_v39 }
 0x25d   : > { %v1230_v10 = vrot.slane %v1229_v54, 4  ;;  %v1005_v50 = vsel %vm941_vm0, %v3281_v0, -inf  ;;  %vm1400_vm5 = vcmp.eq.f32.partialorder %v1399_v7, 8.507059e+37 }
 0x25e   : > { %v1002_v19 = vmax.f32 %v1000_v29, %v1001_v44  ;;  %v871_v14 = vpop.f32.mrf.mxu3 }
 0x25f   : > { %v2399_v60 = vpop.eup %2398  ;;  %v1231_v6 = vadd.f32 %v1230_v10, %v1229_v54 }
 0x260   : > { %v1003_v1 = vrot.slane %v1002_v19, 1  ;;  %v826_v43 = vpop.f32.mrf.mxu2  ;;  %v1391_v26 = vmul.f32 %v2399_v60, %v1226_v39  ;;  %vm1396_vm2 = vweird.f32 %v2399_v60 }
 0x261   : > { %v1232_v9 = vrot.slane %v1231_v6, 2  ;;  %v827_v47 = vadd.f32 %v826_v43, %v3106_v36  ;;  %vm1397_vm4 = vmor %vm1395_vm3, %vm1396_vm2 }
 0x262   : > { %v1004_v38 = vmax.f32 %v1002_v19, %v1003_v1  ;;  %v1392_v3 = vsub.f32 1.0, %v1391_v26  ;;  %v872_v26 = vadd.f32 %v871_v14, %v3106_v36  ;;  %v893_v14 = vld [vmem:[%s3113_s15 + $0x80] sm:$0xff] }
 0x263   : > { %v1233_v55 = vadd.f32 %v1232_v9, %v1231_v6  ;;  %v3284_v17 = vadd.f32 %v892_v46, %v827_v47  ;;  %v907_v9 = vld [vmem:[%s3113_s15 + $0xf0] sm:$0xff] }
 0x264   : > { %v1098_v48 = vsub.f32 %v3261_v62, %v1004_v38  ;;  %v1099_v4 = vsub.f32 %v922_v58, %v1004_v38  ;;  %v1393_v28 = vmul.f32 %v2399_v60, %v1392_v3  ;;  %v1402_v62 = vor.u32 1.1754944e-38, %v1401_v25 }
 0x265   : > { %v1234_v29 = vrot.slane %v1233_v55, 1  ;;  %v1006_v52 = vsel %vm941_vm0, %v3284_v17, -inf  ;;  %v3303_v25 = vadd.f32 %v907_v9, %v872_v26 }
 0x266   : > { %v1142_v54 = vmul.f32 1.442695, %v1098_v48  ;;  %v1144_v44 = vmul.f32 1.442695, %v1099_v4  ;;  %v1007_v10 = vmax.f32 %v1005_v50, %v1006_v52  ;;  %v1394_v15 = vadd.f32 %v2399_v60, %v1393_v28  ;;  %v874_v38 = vpop.f32.mrf.mxu3  ;;  %v908_v28 = vld [vmem:[%s3113_s15 + $0xf8] sm:$0xff]  ;;  %v894_v50 = vld [vmem:[%s3113_s15 + $0x88] sm:$0xff] }
 0x267   : > { %v3291_v19 = vadd.f32 %v1234_v29, %v1233_v55 }
 0x268   : > { %2400 = vpow2.f32 %v1142_v54  ;;  %v1008_v58 = vrot.slane %v1007_v10, 4  ;;  %v829_v5 = vpop.f32.mrf.mxu2  ;;  %v1398_v6 = vsel %vm1397_vm4, %v2399_v60, %v1394_v15 }
 0x269   : > { %2402 = vrcp.f32 %v3291_v19  ;;  %v1403_v1 = vsel %vm1400_vm5, %v1402_v62, %v1398_v6  ;;  %v830_v55 = vadd.f32 %v829_v5, %v3106_v36  ;;  %v1077_v5 = vsel %vm941_vm0, %v3303_v25, -inf }
 0x26a   : > { %2404 = vpow2.f32 %v1144_v44  ;;  %v1009_v43 = vmax.f32 %v1007_v10, %v1008_v58  ;;  %v1404_v39 = vmul.f32 %v3248_v59, %v1403_v1  ;;  %v1405_v46 = vmul.f32 %v3250_v11, %v1403_v1 }
 0x26b   : > { %v875_v11 = vadd.f32 %v874_v38, %v3106_v36  ;;  %v3315_v62 = vadd.f32 %v893_v14, %v830_v55  ;;  %v1417_v26 = vand.u32 2147483648, %v3291_v19  ;;  %v1415_v38 = vand.u32 2147483647, %v3291_v19 }
 0x26c   : > { %v1010_v47 = vrot.slane %v1009_v43, 2  ;;  %1656 = vperm.xlu2 %2236, %v1404_v39   ;;  %1661 = vperm.xlu0 %2234, %v1405_v46   ;;  %vm1411_vm7 = vweird.f32 %v3291_v19 }
 0x26d   : > { %v3319_v6 = vadd.f32 %v908_v28, %v875_v11  ;;  %v1014_v11 = vsel %vm941_vm0, %v3315_v62, -inf  ;;  %vm1416_vm9 = vcmp.eq.f32.partialorder %v1415_v38, 8.507059e+37 }
 0x26e   : > { %v3298_v60 = vpop.eup %2400  ;;  %v1011_v3 = vmax.f32 %v1009_v43, %v1010_v47 }
 0x26f   : > { %v2403_v7 = vpop.eup %2402  ;;  %v1236_v59 = vsel %vm941_vm0, %v3298_v60, 0.0 }
 0x270   : > { %v3307_v48 = vpop.eup %2404  ;;  %v1012_v4 = vrot.slane %v1011_v3, 1  ;;  %v832_v29 = vpop.f32.mrf.mxu2  ;;  %v1407_v52 = vmul.f32 %v2403_v7, %v3291_v19  ;;  %vm1412_vm6 = vweird.f32 %v2403_v7 }
 0x271   : > { %v1237_v54 = vsel %vm941_vm0, %v3307_v48, 0.0  ;;  %v833_v44 = vadd.f32 %v832_v29, %v3106_v36  ;;  %vm1413_vm8 = vmor %vm1411_vm7, %vm1412_vm6  ;;  %v1418_v29 = vor.u32 1.1754944e-38, %v1417_v26 }
 0x272   : > { %v1238_v10 = vadd.f32 %v1237_v54, %v1236_v59  ;;  %v1013_v15 = vmax.f32 %v1011_v3, %v1012_v4  ;;  %v1408_v58 = vsub.f32 1.0, %v1407_v52 }
 0x273   : > { %v3321_v1 = vadd.f32 %v894_v50, %v833_v44 }
 0x274   : > { %v1239_v43 = vrot.slane %v1238_v10, 4  ;;  %v1100_v39 = vsub.f32 %v3281_v0, %v1013_v15  ;;  %v1101_v46 = vsub.f32 %v3284_v17, %v1013_v15  ;;  %v1409_v47 = vmul.f32 %v2403_v7, %v1408_v58 }
 0x275   : > { %v1015_v9 = vsel %vm941_vm0, %v3321_v1, -inf  ;;  %v1078_v0 = vsel %vm941_vm0, %v3319_v6, -inf }
 0x276   : > { %v1240_v3 = vadd.f32 %v1239_v43, %v1238_v10  ;;  %v1146_v55 = vmul.f32 1.442695, %v1100_v39  ;;  %v1148_v59 = vmul.f32 1.442695, %v1101_v46  ;;  %v1016_v14 = vmax.f32 %v1014_v11, %v1015_v9 }
 0x277   : > { %v1410_v17 = vadd.f32 %v2403_v7, %v1409_v47  ;;  %v1079_v44 = vmax.f32 %v1077_v5, %v1078_v0 }
 0x278   : > { %v1241_v4 = vrot.slane %v1240_v3, 2  ;;  %2406 = vpow2.f32 %v1146_v55  ;;  %v835_v28 = vpop.f32.mrf.mxu2  ;;  %v1017_v50 = vrot.slane %v1016_v14, 4  ;;  %v896_v55 = vld [vmem:[%s3113_s15 + $0x98] sm:$0xff] }
 0x279   : > { %2408 = vpow2.f32 %v1148_v59  ;;  %v1414_v52 = vsel %vm1413_vm8, %v2403_v7, %v1410_v17  ;;  %v1080_v9 = vrot.slane %v1079_v44, 4  ;;  %v836_v38 = vadd.f32 %v835_v28, %v3106_v36 }
 0x27a   : > { %v1242_v54 = vadd.f32 %v1241_v4, %v1240_v3  ;;  %v1419_v10 = vsel %vm1416_vm9, %v1418_v29, %v1414_v52  ;;  %v1018_v15 = vmax.f32 %v1016_v14, %v1017_v50 }
 0x27b   : > { %v1421_v58 = vmul.f32 %v3270_v34, %v1419_v10  ;;  %v1420_v43 = vmul.f32 %v3268_v51, %v1419_v10  ;;  %v895_v34 = vld [vmem:[%s3113_s15 + $0x90] sm:$0xff]  ;;  %v1081_v14 = vmax.f32 %v1079_v44, %v1080_v9 }
 0x27c   : > { %v1243_v19 = vrot.slane %v1242_v54, 1  ;;  %v1019_v39 = vrot.slane %v1018_v15, 2  ;;  %v3348_v29 = vadd.f32 %v895_v34, %v836_v38 }
 0x27d   : > { %1671 = vperm.xlu2 %2236, %v1421_v58   ;;  %1666 = vperm.xlu1 %2235, %v1420_v43  }
 0x27e   : > { %v3336_v46 = vpop.eup %2406  ;;  %v1244_v26 = vadd.f32 %v1243_v19, %v1242_v54  ;;  %v1020_v47 = vmax.f32 %v1018_v15, %v1019_v39  ;;  %v1082_v15 = vrot.slane %v1081_v14, 2  ;;  %v1023_v44 = vsel %vm941_vm0, %v3348_v29, -inf }
 0x27f   : > { %v3338_v7 = vpop.eup %2408  ;;  %v1245_v5 = vsel %vm941_vm0, %v3336_v46, 0.0 }
 0x280   : > { %2410 = vrcp.f32 %v1244_v26  ;;  %v1246_v51 = vsel %vm941_vm0, %v3338_v7, 0.0  ;;  %v838_v3 = vpop.f32.mrf.mxu2  ;;  %v1021_v11 = vrot.slane %v1020_v47, 1  ;;  %v1083_v34 = vmax.f32 %v1081_v14, %v1082_v15 }
 0x281   : > { %v1247_v59 = vadd.f32 %v1246_v51, %v1245_v5  ;;  %v839_v0 = vadd.f32 %v838_v3, %v3106_v36  ;;  %v1433_v3 = vand.u32 2147483648, %v1244_v26  ;;  %vm1427_vm11 = vweird.f32 %v1244_v26 }
 0x282   : > { %v1022_v4 = vmax.f32 %v1020_v47, %v1021_v11  ;;  %v1431_v11 = vand.u32 2147483647, %v1244_v26 }
 0x283   : > { %v1248_v17 = vrot.slane %v1247_v59, 4  ;;  %v3350_v50 = vadd.f32 %v896_v55, %v839_v0  ;;  %v1434_v14 = vor.u32 1.1754944e-38, %v1433_v3 }
 0x284   : > { %v1102_v28 = vsub.f32 %v3315_v62, %v1022_v4  ;;  %v1103_v54 = vsub.f32 %v3321_v1, %v1022_v4  ;;  %vm1432_vm13 = vcmp.eq.f32.partialorder %v1431_v11, 8.507059e+37 }
 0x285   : > { %v1249_v52 = vadd.f32 %v1248_v17, %v1247_v59  ;;  %v1024_v58 = vsel %vm941_vm0, %v3350_v50, -inf }
 0x286   : > { %v2411_v10 = vpop.eup %2410  ;;  %v1150_v19 = vmul.f32 1.442695, %v1102_v28  ;;  %v1152_v39 = vmul.f32 1.442695, %v1103_v54  ;;  %v1025_v9 = vmax.f32 %v1023_v44, %v1024_v58  ;;  %v897_v28 = vld [vmem:[%s3113_s15 + $0xa0] sm:$0xff]  ;;  %v1084_v58 = vrot.slane %v1083_v34, 1 }
 0x287   : > { %v1250_v43 = vrot.slane %v1249_v52, 2  ;;  %v1423_v47 = vmul.f32 %v2411_v10, %v1244_v26  ;;  %vm1428_vm10 = vweird.f32 %v2411_v10  ;;  %v898_v44 = vld [vmem:[%s3113_s15 + $0xa8] sm:$0xff] }
 0x288   : > { %v841_v5 = vpop.f32.mrf.mxu2  ;;  %2412 = vpow2.f32 %v1150_v19  ;;  %v1026_v62 = vrot.slane %v1025_v9, 4  ;;  %vm1429_vm12 = vmor %vm1427_vm11, %vm1428_vm10  ;;  %v3379_v11 = vmax.f32 %v1083_v34, %v1084_v58  ;;  %vm1950_vm11 = vcmask 1041409  }
 0x289   : > { %v1251_v38 = vadd.f32 %v1250_v43, %v1249_v52  ;;  %2414 = vpow2.f32 %v1152_v39  ;;  %v1424_v1 = vsub.f32 1.0, %v1423_v47  ;;  %v842_v17 = vadd.f32 %v841_v5, %v3106_v36 }
 0x28a   : > { %v1027_v55 = vmax.f32 %v1025_v9, %v1026_v62 }
 0x28b   : > { %v1252_v51 = vrot.slane %v1251_v38, 1  ;;  %v1425_v59 = vmul.f32 %v2411_v10, %v1424_v1  ;;  %v3372_v5 = vadd.f32 %v897_v28, %v842_v17 }
 0x28c   : > { %v1028_v4 = vrot.slane %v1027_v55, 2 }
 0x28d   : > { %v3358_v0 = vadd.f32 %v1252_v51, %v1251_v38  ;;  %v1426_v54 = vadd.f32 %v2411_v10, %v1425_v59  ;;  %v1032_v17 = vsel %vm941_vm0, %v3372_v5, -inf }
 0x28e   : > { %v3362_v52 = vpop.eup %2412  ;;  %v1029_v19 = vmax.f32 %v1027_v55, %v1028_v4 }
 0x28f   : > { %2416 = vrcp.f32 %v3358_v0  ;;  %v3365_v15 = vpop.eup %2414  ;;  %v1254_v43 = vsel %vm941_vm0, %v3362_v52, 0.0  ;;  %v1430_v9 = vsel %vm1429_vm12, %v2411_v10, %v1426_v54  ;;  %vm1443_vm15 = vweird.f32 %v3358_v0 }
 0x290   : > { %v844_v39 = vpop.f32.mrf.mxu2  ;;  %v1255_v26 = vsel %vm941_vm0, %v3365_v15, 0.0  ;;  %v1435_v38 = vsel %vm1432_vm13, %v1434_v14, %v1430_v9  ;;  %v1030_v1 = vrot.slane %v1029_v19, 1  ;;  %v1116_v9 = vsub.f32 %v3303_v25, %v3379_v11 }
 0x291   : > { %v845_v47 = vadd.f32 %v844_v39, %v3106_v36  ;;  %v1256_v62 = vadd.f32 %v1255_v26, %v1254_v43  ;;  %v1437_v51 = vmul.f32 %v3307_v48, %v1435_v38  ;;  %v1436_v3 = vmul.f32 %v3298_v60, %v1435_v38 }
 0x292   : > { %v1031_v4 = vmax.f32 %v1029_v19, %v1030_v1  ;;  %vm1952_vm12 = vcmask 1042434  }
 0x293   : > { %v3377_v59 = vadd.f32 %v898_v44, %v845_v47  ;;  %v1257_v55 = vrot.slane %v1256_v62, 4  ;;  %1681 = vperm.xlu1 %2235, %v1437_v51   ;;  %1676 = vperm.xlu0 %2234, %v1436_v3  }
 0x294   : > { %v1104_v48 = vsub.f32 %v3348_v29, %v1031_v4  ;;  %v1105_v60 = vsub.f32 %v3350_v50, %v1031_v4  ;;  %v1449_v29 = vand.u32 2147483648, %v3358_v0 }
 0x295   : > { %v2417_v10 = vpop.eup %2416  ;;  %v1033_v28 = vsel %vm941_vm0, %v3377_v59, -inf  ;;  %v1258_v54 = vadd.f32 %v1257_v55, %v1256_v62  ;;  %v1447_v62 = vand.u32 2147483647, %v3358_v0  ;;  %v899_v55 = vld [vmem:[%s3113_s15 + $0xb0] sm:$0xff] }
 0x296   : > { %v1034_v14 = vmax.f32 %v1032_v17, %v1033_v28  ;;  %v1439_v43 = vmul.f32 %v2417_v10, %v3358_v0  ;;  %v1154_v39 = vmul.f32 1.442695, %v1104_v48  ;;  %v1156_v44 = vmul.f32 1.442695, %v1105_v60 }
 0x297   : > { %v1259_v19 = vrot.slane %v1258_v54, 2  ;;  %vm1444_vm14 = vweird.f32 %v2417_v10  ;;  %v1178_v48 = vmul.f32 1.442695, %v1116_v9  ;;  %vm1448_vm2 = vcmp.eq.f32.partialorder %v1447_v62, 8.507059e+37 }
 0x298   : > { %v1035_v34 = vrot.slane %v1034_v14, 4  ;;  %v847_v58 = vpop.f32.mrf.mxu2  ;;  %v1440_v26 = vsub.f32 1.0, %v1439_v43  ;;  %2418 = vpow2.f32 %v1154_v39  ;;  %vm1445_vm1 = vmor %vm1443_vm15, %vm1444_vm14 }
 0x299   : > { %v1260_v47 = vadd.f32 %v1259_v19, %v1258_v54  ;;  %2420 = vpow2.f32 %v1156_v44  ;;  %v848_v3 = vadd.f32 %v847_v58, %v3106_v36  ;;  %v1450_v54 = vor.u32 1.1754944e-38, %v1449_v29  ;;  %v900_v44 = vld [vmem:[%s3113_s15 + $0xb8] sm:$0xff] }
 0x29a   : > { %v1036_v38 = vmax.f32 %v1034_v14, %v1035_v34  ;;  %v1441_v50 = vmul.f32 %v2417_v10, %v1440_v26 }
 0x29b   : > { %v1261_v1 = vrot.slane %v1260_v47, 1  ;;  %v3400_v19 = vadd.f32 %v899_v55, %v848_v3 }
 0x29c   : > { %v1037_v51 = vrot.slane %v1036_v38, 2  ;;  %v1442_v4 = vadd.f32 %v2417_v10, %v1441_v50 }
 0x29d   : > { %v3395_v25 = vadd.f32 %v1261_v1, %v1260_v47  ;;  %v1117_v47 = vsub.f32 %v3319_v6, %v3379_v11 }
 0x29e   : > { %v1038_v17 = vmax.f32 %v1036_v38, %v1037_v51  ;;  %v1617_v28 = vpop.permute.xlu0 %1616  ;;  %v1446_v60 = vsel %vm1445_vm1, %v2417_v10, %v1442_v4  ;;  %v3397_v14 = vpop.eup %2418 }
 0x29f   : > { %2422 = vrcp.f32 %v3395_v25  ;;  %v1451_v34 = vsel %vm1448_vm2, %v1450_v54, %v1446_v60  ;;  %v3403_v0 = vpop.eup %2420  ;;  %v1263_v58 = vsel %vm941_vm0, %v3397_v14, 0.0  ;;  %v1180_v3 = vmul.f32 1.442695, %v1117_v47 }
 0x2a0   : > { %v1039_v43 = vrot.slane %v1038_v17, 1  ;;  %v850_v39 = vpop.f32.mrf.mxu2  ;;  %v1452_v10 = vmul.f32 %v3336_v46, %v1451_v34  ;;  %v1453_v9 = vmul.f32 %v3338_v7, %v1451_v34  ;;  %v1264_v38 = vsel %vm941_vm0, %v3403_v0, 0.0 }
 0x2a1   : > { %v851_v26 = vadd.f32 %v850_v39, %v3106_v36  ;;  %v1265_v50 = vadd.f32 %v1264_v38, %v1263_v58  ;;  %2424 = vpow2.f32 %v1178_v48  ;;  %v1041_v7 = vsel %vm941_vm0, %v3400_v19, -inf }
 0x2a2   : > { %v1040_v29 = vmax.f32 %v1038_v17, %v1039_v43  ;;  %1686 = vperm.xlu2 %2236, %v1452_v10   ;;  %1691 = vperm.xlu0 %2234, %v1453_v9   ;;  %v1774_v48 = vmul.f32 %v1617_v28, %v2868_v8  ;;  %v1463_v8 = vand.u32 2147483647, %v3395_v25  ;;  %vm1459_vm4 = vweird.f32 %v3395_v25 }
 0x2a3   : > { %v3414_v62 = vadd.f32 %v900_v44, %v851_v26  ;;  %v1266_v46 = vrot.slane %v1265_v50, 4 }
 0x2a4   : > { %v1106_v1 = vsub.f32 %v3372_v5, %v1040_v29  ;;  %v1107_v51 = vsub.f32 %v3377_v59, %v1040_v29  ;;  %vm3446_vm6 = vcmp.eq.f32.partialorder %v1463_v8, 8.507059e+37 }
 0x2a5   : > { %v1042_v6 = vsel %vm941_vm0, %v3414_v62, -inf  ;;  %v2423_v11 = vpop.eup %2422  ;;  %v1267_v60 = vadd.f32 %v1266_v46, %v1265_v50 }
 0x2a6   : > { %v1158_v55 = vmul.f32 1.442695, %v1106_v1  ;;  %v1160_v4 = vmul.f32 1.442695, %v1107_v51  ;;  %v1043_v17 = vmax.f32 %v1041_v7, %v1042_v6  ;;  %v1622_v54 = vpop.permute.xlu0 %1621  ;;  %v1455_v59 = vmul.f32 %v2423_v11, %v3395_v25  ;;  %v1637_v39 = vpop.permute.xlu2 %1636 }
 0x2a7   : > { %v1775_v5 = vmul.f32 %v1622_v54, %v2870_v12  ;;  %v1268_v34 = vrot.slane %v1267_v60, 2  ;;  %v3425_v26 = vpop.eup %2424  ;;  %v1465_v12 = vand.u32 2147483648, %v3395_v25  ;;  %vm1460_vm3 = vweird.f32 %v2423_v11 }
 0x2a8   : > { %2426 = vpow2.f32 %v1158_v55  ;;  %v1044_v43 = vrot.slane %v1043_v17, 4  ;;  %v853_v44 = vpop.f32.mrf.mxu2  ;;  %v1456_v9 = vsub.f32 1.0, %v1455_v59  ;;  %v1317_v50 = vsel %vm941_vm0, %v3425_v26, 0.0  ;;  %vm3442_vm5 = vmor %vm1459_vm4, %vm1460_vm3 }
 0x2a9   : > { %2428 = vpow2.f32 %v1160_v4  ;;  %v1806_v58 = vadd.f32 %v1775_v5, %v1774_v48  ;;  %v1269_v47 = vadd.f32 %v1268_v34, %v1267_v60  ;;  %v854_v51 = vadd.f32 %v853_v44, %v3106_v36 }
 0x2aa   : > { %2430 = vpow2.f32 %v1180_v3  ;;  %v1045_v10 = vmax.f32 %v1043_v17, %v1044_v43  ;;  %v1457_v29 = vmul.f32 %v2423_v11, %v1456_v9  ;;  %v901_v3 = vld [vmem:[%s3113_s15 + $0xc0] sm:$0xff]  ;;  %v1466_v59 = vor.u32 1.1754944e-38, %v1465_v12  ;;  %v902_v12 = vld [vmem:[%s3113_s15 + $0xc8] sm:$0xff] }
 0x2ab   : > { %v1807_v38 = vrot.slane %v1806_v58, 4  ;;  %v1270_v1 = vrot.slane %v1269_v47, 1  ;;  %v1778_v34 = vmul.f32 %v1637_v39, %v2876_v18  ;;  %vm1954_vm3 = vcmask 1043459  }
 0x2ac   : > { %v1046_v28 = vrot.slane %v1045_v10, 2  ;;  %v1458_v4 = vadd.f32 %v2423_v11, %v1457_v29 }
 0x2ad   : > { %v1808_v6 = vadd.f32 %v1807_v38, %v1806_v58  ;;  %v3438_v54 = vadd.f32 %v1270_v1, %v1269_v47  ;;  %v3458_v38 = vadd.f32 %v901_v3, %v854_v51 }
 0x2ae   : > { %v3432_v46 = vpop.eup %2426  ;;  %v1047_v7 = vmax.f32 %v1045_v10, %v1046_v28  ;;  %v1627_v55 = vpop.permute.xlu1 %1626  ;;  %v1462_v9 = vsel %vm3442_vm5, %v2423_v11, %v1458_v4 }
 0x2af   : > { %v3436_v17 = vpop.eup %2428  ;;  %v1272_v60 = vsel %vm941_vm0, %v3432_v46, 0.0  ;;  %v1642_v58 = vpop.permute.xlu2 %1641  ;;  %2432 = vrcp.f32 %v3438_v54  ;;  %v1809_v29 = vrot.slane %v1808_v6, 2  ;;  %v1467_v18 = vsel %vm3446_vm6, %v1466_v59, %v1462_v9 }
 0x2b0   : > { %v3450_v43 = vpop.eup %2430  ;;  %v1273_v25 = vsel %vm941_vm0, %v3436_v17, 0.0  ;;  %v1048_v44 = vrot.slane %v1047_v7, 1  ;;  %v856_v10 = vpop.f32.mrf.mxu2  ;;  %v1779_v8 = vmul.f32 %v1642_v58, %v2878_v20  ;;  %v1469_v4 = vmul.f32 %v3365_v15, %v1467_v18 }
 0x2b1   : > { %v1274_v47 = vadd.f32 %v1273_v25, %v1272_v60  ;;  %v857_v1 = vadd.f32 %v856_v10, %v3106_v36  ;;  %v1318_v39 = vsel %vm941_vm0, %v3450_v43, 0.0  ;;  %v1050_v5 = vsel %vm941_vm0, %v3458_v38, -inf }
 0x2b2   : > { %v1049_v28 = vmax.f32 %v1047_v7, %v1048_v44  ;;  %v1820_v11 = vadd.f32 %v1779_v8, %v1778_v34  ;;  %v1468_v7 = vmul.f32 %v3362_v52, %v1467_v18  ;;  %1701 = vperm.xlu2 %2236, %v1469_v4   ;;  %v1810_v58 = vadd.f32 %v1809_v29, %v1808_v6 }
 0x2b3   : > { %v1275_v48 = vrot.slane %v1274_v47, 4  ;;  %v3470_v20 = vadd.f32 %v902_v12, %v857_v1  ;;  %v1776_v52 = vmul.f32 %v1627_v55, %v2872_v13  ;;  %v1481_v13 = vand.u32 2147483648, %v3438_v54 }
 0x2b4   : > { %v1108_v51 = vsub.f32 %v3400_v19, %v1049_v28  ;;  %v1109_v3 = vsub.f32 %v3414_v62, %v1049_v28  ;;  %v1821_v59 = vrot.slane %v1820_v11, 4  ;;  %1696 = vperm.xlu1 %2235, %v1468_v7   ;;  %v1319_v62 = vadd.f32 %v1318_v39, %v1317_v50 }
 0x2b5   : > { %v1276_v60 = vadd.f32 %v1275_v48, %v1274_v47  ;;  %v1051_v15 = vsel %vm941_vm0, %v3470_v20, -inf  ;;  %v2433_v34 = vpop.eup %2432  ;;  %v1811_v18 = vrot.slane %v1810_v58, 1  ;;  %vm1475_vm8 = vweird.f32 %v3438_v54 }
 0x2b6   : > { %v1162_v25 = vmul.f32 1.442695, %v1108_v51  ;;  %v1164_v44 = vmul.f32 1.442695, %v1109_v3  ;;  %v1632_v19 = vpop.permute.xlu1 %1631  ;;  %v1822_v9 = vadd.f32 %v1821_v59, %v1820_v11  ;;  %v1052_v8 = vmax.f32 %v1050_v5, %v1051_v15  ;;  %v903_v3 = vld [vmem:[%s3113_s15 + $0xd0] sm:$0xff] }
 0x2b7   : > { %v1277_v10 = vrot.slane %v1276_v60, 2  ;;  %v1777_v47 = vmul.f32 %v1632_v19, %v2874_v16  ;;  %v1471_v28 = vmul.f32 %v2433_v34, %v3438_v54  ;;  %v1320_v11 = vrot.slane %v1319_v62, 4 }
 0x2b8   : > { %2434 = vpow2.f32 %v1162_v25  ;;  %v859_v12 = vpop.f32.mrf.mxu2  ;;  %v1823_v29 = vrot.slane %v1822_v9, 2  ;;  %v1053_v1 = vrot.slane %v1052_v8, 4  ;;  %vm1476_vm7 = vweird.f32 %v2433_v34 }
 0x2b9   : > { %v1278_v6 = vadd.f32 %v1277_v10, %v1276_v60  ;;  %2436 = vpow2.f32 %v1164_v44  ;;  %v1813_v48 = vadd.f32 %v1777_v47, %v1776_v52  ;;  %v860_v50 = vadd.f32 %v859_v12, %v3106_v36  ;;  %vm3496_vm9 = vmor %vm1475_vm8, %vm1476_vm7 }
 0x2ba   : > { %v1472_v39 = vsub.f32 1.0, %v1471_v28  ;;  %v1054_v51 = vmax.f32 %v1052_v8, %v1053_v1  ;;  %v1824_v55 = vadd.f32 %v1823_v29, %v1822_v9  ;;  %v1479_v59 = vand.u32 2147483647, %v3438_v54  ;;  %v904_v29 = vld [vmem:[%s3113_s15 + $0xd8] sm:$0xff] }
 0x2bb   : > { %v1279_v4 = vrot.slane %v1278_v6, 1  ;;  %v1814_v16 = vrot.slane %v1813_v48, 4  ;;  %v1812_v44 = vadd.f32 %v1811_v18, %v1810_v58  ;;  %v3489_v19 = vadd.f32 %v903_v3, %v860_v50 }
 0x2bc   : > { %v1473_v7 = vmul.f32 %v2433_v34, %v1472_v39  ;;  %v1055_v60 = vrot.slane %v1054_v51, 2  ;;  %v1482_v54 = vor.u32 1.1754944e-38, %v1481_v13  ;;  %v1825_v12 = vrot.slane %v1824_v55, 1 }
 0x2bd   : > { %v3483_v5 = vadd.f32 %v1279_v4, %v1278_v6  ;;  %v1815_v15 = vadd.f32 %v1814_v16, %v1813_v48  ;;  %vm1480_vm10 = vcmp.eq.f32.partialorder %v1479_v59, 8.507059e+37  ;;  %v3506_v39 = vadd.f32 %v1320_v11, %v1319_v62 }
 0x2be   : > { %v3487_v25 = vpop.eup %2434  ;;  %v1474_v10 = vadd.f32 %v2433_v34, %v1473_v7  ;;  %v1056_v52 = vmax.f32 %v1054_v51, %v1055_v60  ;;  %v1918_v4 = vmul.f32 0.5, %v1812_v44  ;;  %v1826_v40 = vadd.f32 %v1825_v12, %v1824_v55 }
 0x2bf   : > { %v3491_v8 = vpop.eup %2436  ;;  %2438 = vrcp.f32 %v3483_v5  ;;  %v1281_v9 = vsel %vm941_vm0, %v3487_v25, 0.0  ;;  %v1816_v28 = vrot.slane %v1815_v15, 2  ;;  %vm1491_vm14 = vweird.f32 %v3483_v5 }
 0x2c0   : > { %v1282_v58 = vsel %vm941_vm0, %v3491_v8, 0.0  ;;  %v862_v6 = vpop.f32.mrf.mxu2  ;;  %v1478_v1 = vsel %vm3496_vm9, %v2433_v34, %v1474_v10  ;;  %v1057_v48 = vrot.slane %v1056_v52, 1  ;;  %v1059_v34 = vsel %vm941_vm0, %v3489_v19, -inf }
 0x2c1   : > { %v1283_v18 = vadd.f32 %v1282_v58, %v1281_v9  ;;  %v863_v50 = vadd.f32 %v862_v6, %v3106_v36  ;;  %v1817_v51 = vadd.f32 %v1816_v28, %v1815_v15  ;;  %v1483_v3 = vsel %vm1480_vm10, %v1482_v54, %v1478_v1 }
 0x2c2   : > { %v1058_v16 = vmax.f32 %v1056_v52, %v1057_v48  ;;  %v1485_v60 = vmul.f32 %v3403_v0, %v1483_v3  ;;  %v1484_v10 = vmul.f32 %v3397_v14, %v1483_v3  ;;  %v1920_v14 = vmul.f32 0.5, %v1826_v40 }
 0x2c3   : > { %v1284_v13 = vrot.slane %v1283_v18, 4  ;;  %v3508_v7 = vadd.f32 %v904_v29, %v863_v50  ;;  %v1818_v35 = vrot.slane %v1817_v51, 1  ;;  %v1497_v6 = vand.u32 2147483648, %v3483_v5 }
 0x2c4   : > { %v1110_v62 = vsub.f32 %v3458_v38, %v1058_v16  ;;  %v1111_v11 = vsub.f32 %v3470_v20, %v1058_v16  ;;  %1711 = vperm.xlu1 %2235, %v1485_v60   ;;  %1706 = vperm.xlu0 %2234, %v1484_v10   ;;  %v1495_v40 = vand.u32 2147483647, %v3483_v5  ;;  %v905_v16 = vld [vmem:[%s3113_s15 + $0xe0] sm:$0xff]  ;;  %v1322_v60 = vrot.slane %v3506_v39, 2 }
 0x2c5   : > { %v2439_v9 = vpop.eup %2438  ;;  %v1285_v59 = vadd.f32 %v1284_v13, %v1283_v18  ;;  %v1060_v44 = vsel %vm941_vm0, %v3508_v7, -inf  ;;  %v1819_v15 = vadd.f32 %v1818_v35, %v1817_v51  ;;  %vm1956_vm9 = vcmask 1044484  }
 0x2c6   : > { %v1061_v0 = vmax.f32 %v1059_v34, %v1060_v44  ;;  %v1487_v55 = vmul.f32 %v2439_v9, %v3483_v5  ;;  %v1166_v47 = vmul.f32 1.442695, %v1110_v62  ;;  %v1168_v54 = vmul.f32 1.442695, %v1111_v11 }
 0x2c7   : > { %v1286_v52 = vrot.slane %v1285_v59, 2  ;;  %v1919_v58 = vmul.f32 0.5, %v1819_v15  ;;  %vm1492_vm13 = vweird.f32 %v2439_v9  ;;  %v1498_v11 = vor.u32 1.1754944e-38, %v1497_v6 }
 0x2c8   : > { %v1062_v12 = vrot.slane %v1061_v0, 4  ;;  %v865_v38 = vpop.f32.mrf.mxu2  ;;  %v1488_v28 = vsub.f32 1.0, %v1487_v55  ;;  %2440 = vpow2.f32 %v1166_v47  ;;  %vm3531_vm15 = vmor %vm1491_vm14, %vm1492_vm13  ;;  %vm1496_vm1 = vcmp.eq.f32.partialorder %v1495_v40, 8.507059e+37 }
 0x2c9   : > { %v1287_v20 = vadd.f32 %v1286_v52, %v1285_v59  ;;  %2442 = vpow2.f32 %v1168_v54  ;;  %v1951_v35 = vsel %vm1950_vm11, %v1919_v58, %v1918_v4  ;;  %v866_v51 = vadd.f32 %v865_v38, %v3106_v36 }
 0x2ca   : > { %v1063_v29 = vmax.f32 %v1061_v0, %v1062_v12  ;;  %v1489_v1 = vmul.f32 %v2439_v9, %v1488_v28  ;;  %v3522_v48 = vsel %vm1952_vm12, %v1920_v14, %v1951_v35 }
 0x2cb   : > { %v1288_v18 = vrot.slane %v1287_v20, 1  ;;  %v3547_v47 = vadd.f32 %v905_v16, %v866_v51 }
 0x2cc   : > { %v1064_v50 = vrot.slane %v1063_v29, 2  ;;  %v1490_v3 = vadd.f32 %v2439_v9, %v1489_v1 }
 0x2cd   : > { %v3527_v13 = vadd.f32 %v1288_v18, %v1287_v20 }
 0x2ce   : > { %v1065_v34 = vmax.f32 %v1063_v29, %v1064_v50  ;;  %v1652_v10 = vpop.permute.xlu1 %1651  ;;  %v1647_v59 = vpop.permute.xlu0 %1646  ;;  %v1494_v62 = vsel %vm3531_vm15, %v2439_v9, %v1490_v3  ;;  %v906_v9 = vld [vmem:[%s3113_s15 + $0xe8] sm:$0xff]  ;;  %v1323_v29 = vadd.f32 %v1322_v60, %v3506_v39 }
 0x2cf   : > { %v3538_v44 = vpop.eup %2440  ;;  %2444 = vrcp.f32 %v3527_v13  ;;  %v1781_v5 = vmul.f32 %v1652_v10, %v2884_v24  ;;  %v1780_v15 = vmul.f32 %v1647_v59, %v2880_v22  ;;  %v1499_v14 = vsel %vm1496_vm1, %v1498_v11, %v1494_v62  ;;  %v1657_v11 = vpop.permute.xlu2 %1656 }
 0x2d0   : > { %v3543_v0 = vpop.eup %2442  ;;  %v1290_v55 = vsel %vm941_vm0, %v3538_v44, 0.0  ;;  %v1066_v52 = vrot.slane %v1065_v34, 1  ;;  %v868_v54 = vpop.f32.mrf.mxu2  ;;  %v1500_v22 = vmul.f32 %v3432_v46, %v1499_v14  ;;  %v1501_v20 = vmul.f32 %v3436_v17, %v1499_v14 }
 0x2d1   : > { %v1291_v58 = vsel %vm941_vm0, %v3543_v0, 0.0  ;;  %v1827_v12 = vadd.f32 %v1781_v5, %v1780_v15  ;;  %v869_v24 = vadd.f32 %v868_v54, %v3106_v36  ;;  %v1068_v36 = vsel %vm941_vm0, %v3547_v47, -inf }
 0x2d2   : > { %v1292_v38 = vadd.f32 %v1291_v58, %v1290_v55  ;;  %v1067_v28 = vmax.f32 %v1065_v34, %v1066_v52  ;;  %1716 = vperm.xlu2 %2236, %v1500_v22   ;;  %1721 = vperm.xlu0 %2234, %v1501_v20   ;;  %v1324_v60 = vrot.slane %v1323_v29, 1  ;;  %v1511_v15 = vand.u32 2147483647, %v3527_v13 }
 0x2d3   : > { %v1828_v6 = vrot.slane %v1827_v12, 4  ;;  %v3555_v35 = vadd.f32 %v906_v9, %v869_v24  ;;  %v1513_v54 = vand.u32 2147483648, %v3527_v13  ;;  %vm1507_vm4 = vweird.f32 %v3527_v13 }
 0x2d4   : > { %v1293_v1 = vrot.slane %v1292_v38, 4  ;;  %v1112_v18 = vsub.f32 %v3489_v19, %v1067_v28  ;;  %v1113_v40 = vsub.f32 %v3508_v7, %v1067_v28  ;;  %v3567_v9 = vadd.f32 %v1324_v60, %v1323_v29 }
 0x2d5   : > { %v2445_v50 = vpop.eup %2444  ;;  %v1829_v46 = vadd.f32 %v1828_v6, %v1827_v12  ;;  %v1069_v17 = vsel %vm941_vm0, %v3555_v35, -inf  ;;  %v1782_v12 = vmul.f32 %v1657_v11, %v2888_v27  ;;  %vm1512_vm5 = vcmp.eq.f32.partialorder %v1511_v15, 8.507059e+37 }
 0x2d6   : > { %v1294_v51 = vadd.f32 %v1293_v1, %v1292_v38  ;;  %v1170_v3 = vmul.f32 1.442695, %v1112_v18  ;;  %v1172_v16 = vmul.f32 1.442695, %v1113_v40  ;;  %v1070_v4 = vmax.f32 %v1068_v36, %v1069_v17 }
 0x2d7   : > { %v1830_v34 = vrot.slane %v1829_v46, 2  ;;  %v1503_v39 = vmul.f32 %v2445_v50, %v3527_v13  ;;  %vm1508_vm2 = vweird.f32 %v2445_v50  ;;  %v1514_v27 = vor.u32 1.1754944e-38, %v1513_v54 }
 0x2d8   : > { %v1295_v19 = vrot.slane %v1294_v51, 2  ;;  %2446 = vpow2.f32 %v1170_v3  ;;  %v1071_v7 = vrot.slane %v1070_v4, 4  ;;  %vm1509_vm6 = vmor %vm1507_vm4, %vm1508_vm2  ;;  %vm1571_vm1 = vweird.f32 %v3567_v9 }
 0x2d9   : > { %2448 = vpow2.f32 %v1172_v16  ;;  %v1831_v10 = vadd.f32 %v1830_v34, %v1829_v46  ;;  %v1504_v59 = vsub.f32 1.0, %v1503_v39 }
 0x2da   : > { %v1296_v62 = vadd.f32 %v1295_v19, %v1294_v51  ;;  %v1072_v5 = vmax.f32 %v1070_v4, %v1071_v7 }
 0x2db   : > { %v1832_v55 = vrot.slane %v1831_v10, 1  ;;  %v1505_v52 = vmul.f32 %v2445_v50, %v1504_v59 }
 0x2dc   : > { %v1297_v14 = vrot.slane %v1296_v62, 1  ;;  %v1073_v58 = vrot.slane %v1072_v5, 2 }
 0x2dd   : > { %v1833_v24 = vadd.f32 %v1832_v55, %v1831_v10  ;;  %v1506_v22 = vadd.f32 %v2445_v50, %v1505_v52 }
 0x2de   : > { %v3570_v38 = vpop.eup %2446  ;;  %v1298_v28 = vadd.f32 %v1297_v14, %v1296_v62  ;;  %v1074_v20 = vmax.f32 %v1072_v5, %v1073_v58  ;;  %v1662_v6 = vpop.permute.xlu0 %1661 }
 0x2df   : > { %v3573_v1 = vpop.eup %2448  ;;  %v1299_v29 = vsel %vm941_vm0, %v3570_v38, 0.0  ;;  %v1921_v18 = vmul.f32 0.5, %v1833_v24  ;;  %v1783_v40 = vmul.f32 %v1662_v6, %v2893_v32  ;;  %v1510_v17 = vsel %vm1509_vm6, %v2445_v50, %v1506_v22  ;;  %v2463_v22 = vld [vmem:[%s2841_s17 + $0x50] sm:$0xff] }
 0x2e0   : > { %2450 = vrcp.f32 %v1298_v28  ;;  %v1300_v36 = vsel %vm941_vm0, %v3573_v1, 0.0  ;;  %v1075_v46 = vrot.slane %v1074_v20, 1  ;;  %v1515_v16 = vsel %vm1512_vm5, %v1514_v27, %v1510_v17 }
 0x2e1   : > { %v1301_v51 = vadd.f32 %v1300_v36, %v1299_v29  ;;  %v1955_v13 = vsel %vm1954_vm3, %v1921_v18, %v3522_v48  ;;  %v1834_v3 = vadd.f32 %v1783_v40, %v1782_v12  ;;  %v1517_v34 = vmul.f32 %v3491_v8, %v1515_v16  ;;  %v2462_v12 = vld [vmem:[%s2841_s17 + $0x58] sm:$0xff]  ;;  %v1672_v29 = vpop.permute.xlu2 %1671 }
 0x2e2   : > { %v1076_v4 = vmax.f32 %v1074_v20, %v1075_v46  ;;  %v1516_v32 = vmul.f32 %v3487_v25, %v1515_v16  ;;  %2452 = vrcp.f32 %v3567_v9  ;;  %v1529_v55 = vand.u32 2147483648, %v1298_v28 }
 0x2e3   : > { %v1302_v39 = vrot.slane %v1301_v51, 4  ;;  %v1835_v60 = vrot.slane %v1834_v3, 4  ;;  %1731 = vperm.xlu2 %2236, %v1517_v34   ;;  %v1593_v24 = vadd.f32 %v2462_v12, %v2976_v42  ;;  %v1592_v20 = vadd.f32 %v2463_v22, %v2953_v21 }
 0x2e4   : > { %v1114_v19 = vsub.f32 %v3547_v47, %v1076_v4  ;;  %v1115_v7 = vsub.f32 %v3555_v35, %v1076_v4  ;;  %1726 = vperm.xlu1 %2235, %v1516_v32   ;;  %v1527_v35 = vand.u32 2147483647, %v1298_v28  ;;  %vm1523_vm8 = vweird.f32 %v1298_v28 }
 0x2e5   : > { %v1303_v50 = vadd.f32 %v1302_v39, %v1301_v51  ;;  %v1836_v10 = vadd.f32 %v1835_v60, %v1834_v3  ;;  %v1530_v36 = vor.u32 1.1754944e-38, %v1529_v55  ;;  %v1785_v16 = vmul.f32 %v1672_v29, %v1593_v24 }
 0x2e6   : > { %v2451_v48 = vpop.eup %2450  ;;  %v1174_v59 = vmul.f32 1.442695, %v1114_v19  ;;  %v1176_v62 = vmul.f32 1.442695, %v1115_v7  ;;  %vm1528_vm13 = vcmp.eq.f32.partialorder %v1527_v35, 8.507059e+37  ;;  %vm1958_vm5 = vcmask 1045509  }
 0x2e7   : > { %v1304_v11 = vrot.slane %v1303_v50, 2  ;;  %v1837_v8 = vrot.slane %v1836_v10, 2  ;;  %v1519_v25 = vmul.f32 %v2451_v48, %v1298_v28  ;;  %vm1524_vm7 = vweird.f32 %v2451_v48 }
 0x2e8   : > { %2454 = vpow2.f32 %v1174_v59  ;;  %v3588_v52 = vpop.eup %2452  ;;  %vm1525_vm10 = vmor %vm1523_vm8, %vm1524_vm7 }
 0x2e9   : > { %v1305_v5 = vadd.f32 %v1304_v11, %v1303_v50  ;;  %2456 = vpow2.f32 %v1176_v62  ;;  %v1838_v47 = vadd.f32 %v1837_v8, %v1836_v10  ;;  %v1520_v15 = vsub.f32 1.0, %v1519_v25 }
 0x2ea   : > { %v1567_v46 = vmul.f32 %v3588_v52, %v3567_v9  ;;  %vm1572_vm2 = vweird.f32 %v3588_v52 }
 0x2eb   : > { %v1306_v54 = vrot.slane %v1305_v5, 1  ;;  %v1839_v14 = vrot.slane %v1838_v47, 1  ;;  %v1521_v58 = vmul.f32 %v2451_v48, %v1520_v15  ;;  %vm1573_vm6 = vmor %vm1571_vm1, %vm1572_vm2 }
 0x2ec   : > { %v1568_v62 = vsub.f32 1.0, %v1567_v46 }
 0x2ed   : > { %v1307_v6 = vadd.f32 %v1306_v54, %v1305_v5  ;;  %v1840_v18 = vadd.f32 %v1839_v14, %v1838_v47  ;;  %v1522_v40 = vadd.f32 %v2451_v48, %v1521_v58 }
 0x2ee   : > { %v3594_v27 = vpop.eup %2454 }
 0x2ef   : > { %v3598_v17 = vpop.eup %2456  ;;  %2458 = vrcp.f32 %v1307_v6  ;;  %v1308_v21 = vsel %vm941_vm0, %v3594_v27, 0.0  ;;  %v1922_v42 = vmul.f32 0.5, %v1840_v18  ;;  %v1667_v51 = vpop.permute.xlu1 %1666  ;;  %v1526_v3 = vsel %vm1525_vm10, %v2451_v48, %v1522_v40 }
 0x2f0   : > { %v1309_v28 = vsel %vm941_vm0, %v3598_v17, 0.0  ;;  %v1784_v4 = vmul.f32 %v1667_v51, %v1592_v20  ;;  %v1531_v34 = vsel %vm1528_vm13, %v1530_v36, %v1526_v3  ;;  %v1545_v35 = vand.u32 2147483648, %v1307_v6 }
 0x2f1   : > { %v1310_v32 = vadd.f32 %v1309_v28, %v1308_v21  ;;  %v1957_v39 = vsel %vm1956_vm9, %v1922_v42, %v1955_v13  ;;  %v1533_v60 = vmul.f32 %v3543_v0, %v1531_v34  ;;  %v1532_v19 = vmul.f32 %v3538_v44, %v1531_v34  ;;  %v2465_v34 = vld [vmem:[%s2841_s17 + $0x60] sm:$0xff] }
 0x2f2   : > { %v1841_v7 = vadd.f32 %v1785_v16, %v1784_v4  ;;  %v1569_v13 = vmul.f32 %v3588_v52, %v1568_v62  ;;  %v1543_v44 = vand.u32 2147483647, %v1307_v6  ;;  %vm1539_vm14 = vweird.f32 %v1307_v6  ;;  %v2464_v16 = vld [vmem:[%s2841_s17 + $0x68] sm:$0xff] }
 0x2f3   : > { %v1311_v50 = vrot.slane %v1310_v32, 4  ;;  %1741 = vperm.xlu1 %2235, %v1533_v60   ;;  %1736 = vperm.xlu0 %2234, %v1532_v19   ;;  %v1546_v24 = vor.u32 1.1754944e-38, %v1545_v35  ;;  %v1577_v40 = vand.u32 2147483648, %v3567_v9  ;;  %v1575_v21 = vand.u32 2147483647, %v3567_v9 }
 0x2f4   : > { %v1842_v10 = vrot.slane %v1841_v7, 4  ;;  %vm1544_vm4 = vcmp.eq.f32.partialorder %v1543_v44, 8.507059e+37  ;;  %v1570_v29 = vadd.f32 %v3588_v52, %v1569_v13  ;;  %v1595_v4 = vadd.f32 %v2464_v16, %v3020_v63  ;;  %v2467_v44 = vld [vmem:[%s2841_s17 + $0x78] sm:$0xff]  ;;  %v2469_v16 = vld [vmem:[%s2841_s17 + $0x90] sm:$0xff] }
 0x2f5   : > { %v2459_v59 = vpop.eup %2458  ;;  %v1312_v48 = vadd.f32 %v1311_v50, %v1310_v32  ;;  %v1578_v3 = vor.u32 1.1754944e-38, %v1577_v40  ;;  %vm1576_vm7 = vcmp.eq.f32.partialorder %v1575_v21, 8.507059e+37 }
 0x2f6   : > { %v1843_v11 = vadd.f32 %v1842_v10, %v1841_v7  ;;  %v1535_v8 = vmul.f32 %v2459_v59, %v1307_v6  ;;  %vm1540_vm0 = vweird.f32 %v2459_v59  ;;  %v1574_v51 = vsel %vm1573_vm6, %v3588_v52, %v1570_v29 }
 0x2f7   : > { %v1313_v25 = vrot.slane %v1312_v48, 2  ;;  %vm1541_vm15 = vmor %vm1539_vm14, %vm1540_vm0  ;;  %v1579_v32 = vsel %vm1576_vm7, %v1578_v3, %v1574_v51  ;;  %vm1960_vm14 = vcmask 1046534   ;;  %v2468_v3 = vld [vmem:[%s2841_s17 + $0x98] sm:$0xff] }
 0x2f8   : > { %v1844_v5 = vrot.slane %v1843_v11, 2  ;;  %v1536_v47 = vsub.f32 1.0, %v1535_v8 }
 0x2f9   : > { %v1314_v15 = vadd.f32 %v1313_v25, %v1312_v48 }
 0x2fa   : > { %v1845_v0 = vadd.f32 %v1844_v5, %v1843_v11  ;;  %v1537_v55 = vmul.f32 %v2459_v59, %v1536_v47 }
 0x2fb   : > { %v1315_v54 = vrot.slane %v1314_v15, 1 }
 0x2fc   : > { %v1846_v14 = vrot.slane %v1845_v0, 1  ;;  %v1538_v58 = vadd.f32 %v2459_v59, %v1537_v55  ;;  %v1687_v35 = vpop.permute.xlu2 %1686 }
 0x2fd   : > { %v1316_v12 = vadd.f32 %v1315_v54, %v1314_v15  ;;  %v1597_v54 = vadd.f32 %v2467_v44, %v3051_v61 }
 0x2fe   : > { %v1847_v22 = vadd.f32 %v1846_v14, %v1845_v0  ;;  %v1542_v20 = vsel %vm1541_vm15, %v2459_v59, %v1538_v58  ;;  %v2466_v0 = vld [vmem:[%s2841_s17 + $0x70] sm:$0xff]  ;;  %vm1962_vm15 = vcmask 1047559  }
 0x2ff   : > { %2460 = vrcp.f32 %v1316_v12  ;;  %v1547_v18 = vsel %vm1544_vm4, %v1546_v24, %v1542_v20  ;;  %v1561_v52 = vand.u32 2147483648, %v1316_v12  ;;  %v1559_v48 = vand.u32 2147483647, %v1316_v12 }
 0x300   : > { %v1923_v6 = vmul.f32 0.5, %v1847_v22  ;;  %v1548_v36 = vmul.f32 %v3570_v38, %v1547_v18  ;;  %v1549_v46 = vmul.f32 %v3573_v1, %v1547_v18  ;;  %v1594_v38 = vadd.f32 %v2465_v34, %v2998_v56 }
 0x301   : > { %vm1555_vm10 = vweird.f32 %v1316_v12  ;;  %v1562_v11 = vor.u32 1.1754944e-38, %v1561_v52  ;;  %vm1560_vm0 = vcmp.eq.f32.partialorder %v1559_v48, 8.507059e+37  ;;  %v1596_v55 = vadd.f32 %v2466_v0, %v3029_v33 }
 0x302   : > { %v1959_v42 = vsel %vm1958_vm5, %v1923_v6, %v1957_v39  ;;  %1746 = vperm.xlu2 %2236, %v1548_v36   ;;  %1751 = vperm.xlu0 %2234, %v1549_v46   ;;  %v1580_v39 = vmul.f32 %v3425_v26, %v1579_v32 }
 0x305   : > { %v2461_v28 = vpop.eup %2460  ;;  %v1682_v1 = vpop.permute.xlu1 %1681 }
 0x306   : > { %v1677_v60 = vpop.permute.xlu0 %1676  ;;  %v1551_v9 = vmul.f32 %v2461_v28, %v1316_v12  ;;  %v1787_v19 = vmul.f32 %v1682_v1, %v1595_v4  ;;  %vm1556_vm8 = vweird.f32 %v2461_v28  ;;  %v1788_v12 = vmul.f32 %v1687_v35, %v1596_v55  ;;  %v2470_v1 = vld [vmem:[%s2841_s17 + $0x88] sm:$0xff] }
 0x307   : > { %v1786_v7 = vmul.f32 %v1677_v60, %v1594_v38  ;;  %vm1557_vm13 = vmor %vm1555_vm10, %vm1556_vm8  ;;  %v1600_v4 = vadd.f32 %v2469_v16, %v2891_v30  ;;  %v1599_v60 = vadd.f32 %v2470_v1, %v2882_v23 }
 0x308   : > { %v1552_v50 = vsub.f32 1.0, %v1551_v9 }
 0x309   : > { %v1848_v10 = vadd.f32 %v1787_v19, %v1786_v7  ;;  %v2471_v19 = vld [vmem:[%s2841_s17 + $0xa0] sm:$0xff] }
 0x30a   : > { %1766 = vperm.xlu0 %2234, %v1580_v39   ;;  %v1553_v59 = vmul.f32 %v2461_v28, %v1552_v50  ;;  %v1602_v7 = vadd.f32 %v2471_v19, %v2902_v41  ;;  %v2472_v39 = vld [vmem:[%s2841_s17 + $0xa8] sm:$0xff] }
 0x30b   : > { %v1849_v62 = vrot.slane %v1848_v10, 4  ;;  %v1603_v50 = vadd.f32 %v2472_v39, %v2906_v45  ;;  %v2473_v45 = vld [vmem:[%s2841_s17 + $0xb8] sm:$0xff] }
 0x30c   : > { %v1554_v63 = vadd.f32 %v2461_v28, %v1553_v59  ;;  %v1702_v21 = vpop.permute.xlu2 %1701 }
 0x30d   : > { %v1850_v56 = vadd.f32 %v1849_v62, %v1848_v10  ;;  %v1791_v52 = vmul.f32 %v1702_v21, %v1599_v60 }
 0x30e   : > { %v1558_v8 = vsel %vm1557_vm13, %v2461_v28, %v1554_v63  ;;  %v1601_v28 = vadd.f32 %v2468_v3, %v2897_v37 }
 0x30f   : > { %v1851_v25 = vrot.slane %v1850_v56, 2  ;;  %v1563_v5 = vsel %vm1560_vm0, %v1562_v11, %v1558_v8 }
 0x310   : > { %v1565_v26 = vmul.f32 %v3598_v17, %v1563_v5  ;;  %v1564_v47 = vmul.f32 %v3594_v27, %v1563_v5  ;;  %v1581_v27 = vmul.f32 %v3450_v43, %v1579_v32 }
 0x311   : > { %v1852_v15 = vadd.f32 %v1851_v25, %v1850_v56 }
 0x312   : > { %1761 = vperm.xlu2 %2236, %v1565_v26   ;;  %1756 = vperm.xlu1 %2235, %v1564_v47   ;;  %v1605_v47 = vadd.f32 %v2473_v45, %v2915_v53 }
 0x313   : > { %v1853_v13 = vrot.slane %v1852_v15, 1 }
 0x314   : > { %v1692_v58 = vpop.permute.xlu0 %1691 }
 0x315   : > { %v1854_v14 = vadd.f32 %v1853_v13, %v1852_v15  ;;  %v1789_v24 = vmul.f32 %v1692_v58, %v1597_v54  ;;  %v2474_v15 = vld [vmem:[%s2841_s17 + $0xb0] sm:$0xff] }
 0x316   : > { %v1604_v35 = vadd.f32 %v2474_v15, %v2911_v49 }
 0x317   : > { %v1924_v17 = vmul.f32 0.5, %v1854_v14  ;;  %v1855_v22 = vadd.f32 %v1789_v24, %v1788_v12 }
 0x319   : > { %v1961_v20 = vsel %vm1960_vm14, %v1924_v17, %v1959_v42  ;;  %v1856_v29 = vrot.slane %v1855_v22, 4 }
 0x31a   : > { %1771 = vperm.xlu1 %2235, %v1581_v27  }
 0x31b   : > { %v1857_v18 = vadd.f32 %v1856_v29, %v1855_v22 }
 0x31d   : > { %v1858_v33 = vrot.slane %v1857_v18, 2 }
 0x31f   : > { %v1859_v40 = vadd.f32 %v1858_v33, %v1857_v18 }
 0x321   : > { %v1860_v61 = vrot.slane %v1859_v40, 1 }
 0x323   : > { %v1861_v6 = vadd.f32 %v1860_v61, %v1859_v40 }
 0x325   : > { %v1925_v36 = vmul.f32 0.5, %v1861_v6  ;;  %v2475_v6 = vld [vmem:[%s2841_s17 + $0xc8] sm:$0xff] }
 0x326   : > { %v1697_v43 = vpop.permute.xlu1 %1696 }
 0x327   : > { %v1963_v46 = vsel %vm1962_vm15, %v1925_v36, %v1961_v20  ;;  %v1790_v9 = vmul.f32 %v1697_v43, %v3027_v31  ;;  %v1607_v36 = vadd.f32 %v2475_v6, %v2929_v2 }
 0x328   : > { %1973 = vst [vmem:[%s3633_s16] sm:$0xff] %v1963_v46  ;;  %v2476_v46 = vld [vmem:[%s2841_s17 + $0xc0] sm:$0xff]  ;;  %s1987_s17 = scalar_lea.hbm %s3711_s8, %s2829_s14 }
 0x329   : > { %v1862_v48 = vadd.f32 %v1791_v52, %v1790_v9  ;;  %v1606_v43 = vadd.f32 %v2476_v46, %v2920_v57  ;;  %s1990_s22 = sshll.u32 %s1987_s17, 4  ;;  %s1991_s22 = int_to_ptr.hbm [resolvable:$true] %s1990_s22 }
 0x32a   : > { %s2551_s21 = sshra.s32 %s1991_s22, 4  ;;  %s2552_s21 = int_to_ptr.hbm [resolvable:$true] %s2551_s21 }
 0x32b   : > { %v1863_v23 = vrot.slane %v1862_v48, 4  ;;  %s2553_s18 = scalar_lea.hbm %s2552_s21, 16  ;;  %p2558_p9 = scmp.lt.s32.totalorder %s2552_s21, %s3711_s8 }
 0x32c   : > { %v1717_v32 = vpop.permute.xlu2 %1716  ;;  %p2554_p4 = scmp.ne.s32.totalorder %s2552_s21, %s2553_s18  ;;  %p2559_p2 = scmp.lt.s32.totalorder %s2557_s24, %s2553_s18 }
 0x32d   : > { %v1794_v37 = vmul.f32 %v1717_v32, %v1602_v7  ;;  %v1864_v8 = vadd.f32 %v1863_v23, %v1862_v48 }
 0x32e   : > { %p2555_p8 = pnand %p2554_p4, %p2732_p3  ;;  %p2560_p10 = por %p2559_p2, %p2558_p9 }
 0x32f   : > { %v1865_v26 = vrot.slane %v1864_v8, 2 }
 0x330   : > { %p2556_p11 = pneg %p2555_p8 }
 0x331   : > { %v1866_v14 = vadd.f32 %v1865_v26, %v1864_v8 }
 0x332   : > { %p2561_p12 = pnand %p2560_p10, %p2556_p11 }
 0x333   : > { %v1867_v22 = vrot.slane %v1866_v14, 1 }
 0x335   : > { %v1868_v18 = vadd.f32 %v1867_v22, %v1866_v14  ;;  %v3741_v14 = vld [vmem:[#allocation15_spill] sm:$0xff] }
 0x336   : > { %v1707_v42 = vpop.permute.xlu0 %1706  ;;  %v1712_v51 = vpop.permute.xlu1 %1711 }
 0x337   : > { %v1793_v34 = vmul.f32 %v1712_v51, %v1601_v28  ;;  %v1792_v38 = vmul.f32 %v1707_v42, %v1600_v4  ;;  %v1926_v21 = vmul.f32 0.5, %v1868_v18 }
 0x339   : > { %v1869_v59 = vadd.f32 %v1793_v34, %v1792_v38 }
 0x33b   : > { %v1870_v63 = vrot.slane %v1869_v59, 4 }
 0x33d   : > { %v1871_v11 = vadd.f32 %v1870_v63, %v1869_v59  ;;  %v1732_v41 = vpop.permute.xlu2 %1731 }
 0x33e   : > { %v1797_v55 = vmul.f32 %v1732_v41, %v1605_v47  ;;  %v3740_v47 = vld [vmem:[#allocation16_spill] sm:$0xff] }
 0x33f   : > { %v1872_v25 = vrot.slane %v1871_v11, 2 }
 0x341   : > { %v1873_v0 = vadd.f32 %v1872_v25, %v1871_v11 }
 0x343   : > { %v1874_v12 = vrot.slane %v1873_v0, 1 }
 0x344   : > { %v1722_v10 = vpop.permute.xlu0 %1721 }
 0x345   : > { %v1795_v30 = vmul.f32 %v1722_v10, %v1603_v50  ;;  %v1875_v20 = vadd.f32 %v1874_v12, %v1873_v0  ;;  %v3737_v10 = vld [vmem:[#allocation12_spill] sm:$0xff] }
 0x347   : > { %v1876_v62 = vadd.f32 %v1795_v30, %v1794_v37  ;;  %v1927_v49 = vmul.f32 0.5, %v1875_v20  ;;  %v3738_v37 = vld [vmem:[#allocation14_spill] sm:$0xff] }
 0x349   : > { %v1877_v56 = vrot.slane %v1876_v62, 4  ;;  %v1964_v4 = vsel %vm1950_vm11, %v1927_v49, %v1926_v21 }
 0x34b   : > { %v1878_v31 = vadd.f32 %v1877_v56, %v1876_v62 }
 0x34d   : > { %v1879_v5 = vrot.slane %v1878_v31, 2 }
 0x34f   : > { %v1880_v54 = vadd.f32 %v1879_v5, %v1878_v31  ;;  %v3739_v5 = vld [vmem:[#allocation13_spill] sm:$0xff] }
 0x351   : > { %v1881_v17 = vrot.slane %v1880_v54, 1 }
 0x353   : > { %v1882_v53 = vadd.f32 %v1881_v17, %v1880_v54 }
 0x355   : > { %v1928_v61 = vmul.f32 0.5, %v1882_v53 }
 0x356   : > { %v1727_v13 = vpop.permute.xlu1 %1726 }
 0x357   : > { %v1796_v44 = vmul.f32 %v1727_v13, %v1604_v35  ;;  %v1965_v38 = vsel %vm1952_vm12, %v1928_v61, %v1964_v4 }
 0x359   : > { %v1883_v58 = vadd.f32 %v1797_v55, %v1796_v44 }
 0x35b   : > { %v1884_v24 = vrot.slane %v1883_v58, 4 }
 0x35c   : > { %v1747_v7 = vpop.permute.xlu2 %1746 }
 0x35d   : > { %v1885_v27 = vadd.f32 %v1884_v24, %v1883_v58  ;;  %v1800_v52 = vmul.f32 %v1747_v7, %v3737_v10  ;;  %v3742_v24 = vld [vmem:[#allocation17_spill] sm:$0xff] }
 0x35f   : > { %v1886_v29 = vrot.slane %v1885_v27, 2 }
 0x361   : > { %v1887_v33 = vadd.f32 %v1886_v29, %v1885_v27 }
 0x363   : > { %v1888_v40 = vrot.slane %v1887_v33, 1 }
 0x365   : > { %v1889_v42 = vadd.f32 %v1888_v40, %v1887_v33  ;;  %v1742_v51 = vpop.permute.xlu1 %1741  ;;  %v1737_v3 = vpop.permute.xlu0 %1736 }
 0x366   : > { %v1799_v28 = vmul.f32 %v1742_v51, %v1607_v36  ;;  %v1798_v16 = vmul.f32 %v1737_v3, %v1606_v43 }
 0x367   : > { %v1929_v34 = vmul.f32 0.5, %v1889_v42 }
 0x368   : > { %v1890_v32 = vadd.f32 %v1799_v28, %v1798_v16 }
 0x369   : > { %v1966_v1 = vsel %vm1954_vm3, %v1929_v34, %v1965_v38 }
 0x36a   : > { %v1891_v60 = vrot.slane %v1890_v32, 4 }
 0x36c   : > { %v1892_v9 = vadd.f32 %v1891_v60, %v1890_v32  ;;  %v1762_v8 = vpop.permute.xlu2 %1761 }
 0x36d   : > { %v1803_v26 = vmul.f32 %v1762_v8, %v3739_v5 }
 0x36e   : > { %v1893_v2 = vrot.slane %v1892_v9, 2 }
 0x370   : > { %v1894_v19 = vadd.f32 %v1893_v2, %v1892_v9 }
 0x372   : > { %v1895_v57 = vrot.slane %v1894_v19, 1 }
 0x374   : > { %v1896_v39 = vadd.f32 %v1895_v57, %v1894_v19  ;;  %v1752_v50 = vpop.permute.xlu0 %1751 }
 0x375   : > { %v1801_v59 = vmul.f32 %v1752_v50, %v3738_v37 }
 0x376   : > { %v1930_v30 = vmul.f32 0.5, %v1896_v39 }
 0x377   : > { %v1897_v48 = vadd.f32 %v1801_v59, %v1800_v52 }
 0x378   : > { %v1967_v62 = vsel %vm1956_vm9, %v1930_v30, %v1966_v1 }
 0x379   : > { %v1898_v63 = vrot.slane %v1897_v48, 4 }
 0x37b   : > { %v1899_v56 = vadd.f32 %v1898_v63, %v1897_v48 }
 0x37c   : > { %v1767_v55 = vpop.permute.xlu0 %1766 }
 0x37d   : > { %v1900_v23 = vrot.slane %v1899_v56, 2  ;;  %v1804_v58 = vmul.f32 %v1767_v55, %v3741_v14 }
 0x37f   : > { %v1901_v11 = vadd.f32 %v1900_v23, %v1899_v56 }
 0x381   : > { %v1902_v31 = vrot.slane %v1901_v11, 1 }
 0x383   : > { %v1903_v25 = vadd.f32 %v1902_v31, %v1901_v11 }
 0x384   : > { %v1757_v41 = vpop.permute.xlu1 %1756 }
 0x385   : > { %v1931_v45 = vmul.f32 0.5, %v1903_v25  ;;  %v1802_v15 = vmul.f32 %v1757_v41, %v3740_v47 }
 0x387   : > { %v1968_v35 = vsel %vm1958_vm5, %v1931_v45, %v1967_v62  ;;  %v1904_v13 = vadd.f32 %v1803_v26, %v1802_v15 }
 0x389   : > { %v1905_v0 = vrot.slane %v1904_v13, 4 }
 0x38b   : > { %v1906_v44 = vadd.f32 %v1905_v0, %v1904_v13 }
 0x38c   : > { %v1772_v54 = vpop.permute.xlu1 %1771 }
 0x38d   : > { %v1907_v12 = vrot.slane %v1906_v44, 2  ;;  %v1805_v17 = vmul.f32 %v1772_v54, %v3742_v24 }
 0x38f   : > { %v1908_v22 = vadd.f32 %v1907_v12, %v1906_v44  ;;  %v1911_v27 = vadd.f32 %v1805_v17, %v1804_v58 }
 0x391   : > { %v1909_v20 = vrot.slane %v1908_v22, 1  ;;  %v1912_v29 = vrot.slane %v1911_v27, 4 }
 0x393   : > { %v1910_v53 = vadd.f32 %v1909_v20, %v1908_v22  ;;  %v1913_v18 = vadd.f32 %v1912_v29, %v1911_v27 }
 0x395   : > { %v1932_v33 = vmul.f32 0.5, %v1910_v53  ;;  %v1914_v49 = vrot.slane %v1913_v18, 2 }
 0x397   : > { %v1969_v40 = vsel %vm1960_vm14, %v1932_v33, %v1968_v35  ;;  %v1915_v61 = vadd.f32 %v1914_v49, %v1913_v18 }
 0x399   : > { %v1916_v6 = vrot.slane %v1915_v61, 1 }
 0x39b   : > { %v1917_v36 = vadd.f32 %v1916_v6, %v1915_v61 }
 0x39d   : > { %v1933_v46 = vmul.f32 0.5, %v1917_v36 }
 0x39f   : > { %v1970_v43 = vsel %vm1962_vm15, %v1933_v46, %v1969_v40 }
 0x3a0   : > { %1974 = vst [vmem:[%s3633_s16 + $0x8] sm:$0xff] %v1970_v43 }
 0x3a1   : > { %2564 = shalt.err (!%p2561_p12)
}
 0x3a2   : > { %s2613_s28 = smov 128   ;;  %s2614_s15 = smov 8  }
 0x3a3   : > { %2178 = dma.vmem_to_hbm [thread:$0]  (%p2732_p3), %s1989_s19, 256, %s1991_s22, %s1976_s7, %s2613_s28, %s2613_s28, %s2614_s15  }
 0x3a4 PF: > { %s2005_s16 = sand.u32 1, %s2595_s29   ;;  %p3743_p13 = scmp.ge.s32.totalorder %s2607_s10, 2 }
 0x3a5   : > { %s2006_s4 = scalar_lea.sflag [#allocation5], %s2005_s16 }
 0x3a6   : > { %p2189_p0 = pnand %p3743_p13, %p2698_p6 }
 0x3a8   : > { %p2190_p5 = pneg %p2189_p0 }
 0x3aa   : > { %2590 = dma.done.wait (%p2190_p5), %s2006_s4, 256  }
 0x3ab   : > { %2592 = vsyncadd (%p2190_p5), %s2006_s4, 4294967040  ;;  %p23_p7 = scmp.ge.s32.totalorder %s2716_s20, 4   ;;  %s3744_s29 = smov %s2599_s30 }
 0x3ac   : > { %s3745_s30 = smov %s2603_s9  ;;  %s3746_s9 = smov %s2728_s25 }
 0x3ad   : > { %s3747_s10 = smov %s2716_s20  ;;  %25 = sbr.rel (!%p23_p7) target bundleno = 9 (0x9), region = 107 }
 0x3b2   :  { %2012 = vsyncpa [#allocation4], 1 }
 0x3b3   :  { %2014 = vsyncpa [#allocation4 + $0x1], 1 }
 0x3b4   :  { %2015 = vsyncpa [#allocation7], 1 }
 0x3b5   :  { %2016 = vsyncpa [#allocation5], 1 }
 0x3b6   :  { %2018 = vsyncpa [#allocation5 + $0x1], 1 }

</bundles_post_ra>
